<compile_context>
chip_gen: v7x
topology: tpu7x:2x2x1
jax: 0.10.0
libtpu: 0.0.40
codegen_flags: <defaults>
</compile_context>

<pallas_src>
import functools

import jax
import jax.numpy as jnp
from jax import lax
from jax.experimental import pallas as pl
from jax.experimental.pallas import tpu as pltpu


def bottleneck_kernel(x_ref, w1_ref, s1_ref, t1_ref, w2_ref, s2_ref, t2_ref,
                      o_ref, hpad_ref, *, use_shortcut):
    # x_ref : (1, H, W, C_in)   f32   one batch element (NHWC)
    # w1_ref: (C_in, Ch)        f32   1x1 conv weight (transposed from torch)
    # s1_ref/t1_ref: (1, Ch)    f32   folded BN1 scale / shift
    # w2_ref: (9, Ch, C_out)    f32   3x3 conv weight, taps flattened (ky*3+kx)
    # s2_ref/t2_ref: (1, C_out) f32   folded BN2 scale / shift
    # o_ref : (1, H, W, C_out)  f32
    # hpad_ref: VMEM scratch (H+2, W+2, Ch) f32  zero-padded intermediate
    _, H, W, C_out = o_ref.shape
    C_in = x_ref.shape[-1]
    Ch = w1_ref.shape[-1]

    x = x_ref[0].astype(jnp.float32)                       # (H, W, C_in)

    # ---- conv1 (1x1) + folded BN1 + ReLU, all on the MXU/VPU --------------
    h = jnp.dot(x.reshape(H * W, C_in), w1_ref[...],
                preferred_element_type=jnp.float32)        # (H*W, Ch)
    h = h * s1_ref[...] + t1_ref[...]
    h = jnp.maximum(h, 0.0).reshape(H, W, Ch)

    # ---- zero-pad the ReLU output into VMEM scratch (Conv2d padding=1) ----
    hpad_ref[...] = jnp.zeros_like(hpad_ref)
    hpad_ref[1:H + 1, 1:W + 1, :] = h

    # ---- conv2 (3x3) as 9 shifted matmuls accumulated in f32 -------------
    acc = jnp.zeros((H * W, C_out), jnp.float32)
    for ky in range(3):
        for kx in range(3):
            win = hpad_ref[ky:ky + H, kx:kx + W, :].reshape(H * W, Ch)
            acc = acc + jnp.dot(win, w2_ref[ky * 3 + kx],
                                preferred_element_type=jnp.float32)

    # ---- folded BN2 + residual + ReLU -------------------------------------
    y = (acc * s2_ref[...] + t2_ref[...]).reshape(H, W, C_out)
    if use_shortcut:
        y = y + x                                           # C_in == C_out guaranteed
    o_ref[0] = jnp.maximum(y, 0.0).astype(o_ref.dtype)


def bottleneck_forward(x, conv1_w, bn1, conv2_w, bn2, *, shortcut=True,
                       groups=1, eps=1e-5):
    """x: (B, C_in, H, W) f32 (NCHW, like torch). Returns (B, C_out, H, W)."""
    assert groups == 1  # TODO(synk): grouped 3x3 conv not implemented.
    B, C_in, H, W = x.shape
    Ch = conv1_w.shape[0]
    C_out = conv2_w.shape[0]
    use_shortcut = bool(shortcut) and (C_in == C_out)

    # Fold BatchNorm (running stats) into per-channel scale/shift.
    g1, b1, m1, v1 = bn1
    s1 = g1 / jnp.sqrt(v1 + eps)
    t1 = b1 - m1 * s1
    g2, b2, m2, v2 = bn2
    s2 = g2 / jnp.sqrt(v2 + eps)
    t2 = b2 - m2 * s2

    # Layout plumbing: NCHW -> NHWC (channels on lanes), weights to matmul form.
    x_nhwc = jnp.transpose(x, (0, 2, 3, 1))                       # (B, H, W, C_in)
    w1 = jnp.transpose(conv1_w[:, :, 0, 0], (1, 0))               # (C_in, Ch)
    w2 = jnp.transpose(conv2_w, (2, 3, 1, 0)).reshape(9, Ch, C_out)

    kernel = functools.partial(bottleneck_kernel, use_shortcut=use_shortcut)

    flops = 2 * B * H * W * (C_in * Ch + 9 * Ch * C_out)
    bytes_accessed = 4 * (x_nhwc.size + B * H * W * C_out + w1.size + w2.size)

    out = pl.pallas_call(
        kernel,
        out_shape=jax.ShapeDtypeStruct((B, H, W, C_out), jnp.float32),
        grid=(B,),
        in_specs=[
            pl.BlockSpec((1, H, W, C_in), lambda b: (b, 0, 0, 0)),
            pl.BlockSpec((C_in, Ch), lambda b: (0, 0)),
            pl.BlockSpec((1, Ch), lambda b: (0, 0)),
            pl.BlockSpec((1, Ch), lambda b: (0, 0)),
            pl.BlockSpec((9, Ch, C_out), lambda b: (0, 0, 0)),
            pl.BlockSpec((1, C_out), lambda b: (0, 0)),
            pl.BlockSpec((1, C_out), lambda b: (0, 0)),
        ],
        out_specs=pl.BlockSpec((1, H, W, C_out), lambda b: (b, 0, 0, 0)),
        scratch_shapes=[pltpu.VMEM((H + 2, W + 2, Ch), jnp.float32)],
        compiler_params=pltpu.CompilerParams(
            dimension_semantics=("parallel",),
            vmem_limit_bytes=64 * 1024 * 1024,
        ),
        cost_estimate=pl.CostEstimate(
            flops=flops, transcendentals=0, bytes_accessed=bytes_accessed),
    )(x_nhwc, w1, s1.reshape(1, Ch), t1.reshape(1, Ch),
      w2, s2.reshape(1, C_out), t2.reshape(1, C_out))

    return jnp.transpose(out, (0, 3, 1, 2))                       # back to NCHW


def _reference(x, conv1_w, bn1, conv2_w, bn2, *, shortcut=True, eps=1e-5):
    """Pure-JAX reference mirroring the PyTorch forward (eval-mode BN)."""
    g1, b1, m1, v1 = bn1
    g2, b2, m2, v2 = bn2
    y = lax.conv_general_dilated(x, conv1_w, window_strides=(1, 1),
                                 padding="VALID",
                                 dimension_numbers=("NCHW", "OIHW", "NCHW"))
    y = (y - m1[None, :, None, None]) / jnp.sqrt(v1[None, :, None, None] + eps)
    y = y * g1[None, :, None, None] + b1[None, :, None, None]
    y = jnp.maximum(y, 0.0)
    y = lax.conv_general_dilated(y, conv2_w, window_strides=(1, 1),
                                 padding=((1, 1), (1, 1)),
                                 dimension_numbers=("NCHW", "OIHW", "NCHW"))
    y = (y - m2[None, :, None, None]) / jnp.sqrt(v2[None, :, None, None] + eps)
    y = y * g2[None, :, None, None] + b2[None, :, None, None]
    if shortcut and x.shape[1] == conv2_w.shape[0]:
        y = y + x
    return jnp.maximum(y, 0.0)


if __name__ == "__main__":
    B, C_in, C_out, H, W = 2, 8, 8, 16, 16
    e = 0.5
    Ch = int(C_out * e)  # hidden channels = 4

    key = jax.random.PRNGKey(0)
    ks = jax.random.split(key, 11)
    x = jax.random.normal(ks[0], (B, C_in, H, W), dtype=jnp.float32)
    conv1_w = jax.random.normal(ks[1], (Ch, C_in, 1, 1), dtype=jnp.float32) * 0.2
    conv2_w = jax.random.normal(ks[2], (C_out, Ch, 3, 3), dtype=jnp.float32) * 0.2
    bn1 = (jax.random.uniform(ks[3], (Ch,), dtype=jnp.float32, minval=0.5, maxval=1.5),
           jax.random.normal(ks[4], (Ch,), dtype=jnp.float32) * 0.1,
           jax.random.normal(ks[5], (Ch,), dtype=jnp.float32) * 0.1,
           jax.random.uniform(ks[6], (Ch,), dtype=jnp.float32, minval=0.5, maxval=1.5))
    bn2 = (jax.random.uniform(ks[7], (C_out,), dtype=jnp.float32, minval=0.5, maxval=1.5),
           jax.random.normal(ks[8], (C_out,), dtype=jnp.float32) * 0.1,
           jax.random.normal(ks[9], (C_out,), dtype=jnp.float32) * 0.1,
           jax.random.uniform(ks[10], (C_out,), dtype=jnp.float32, minval=0.5, maxval=1.5))

    out = bottleneck_forward(x, conv1_w, bn1, conv2_w, bn2, shortcut=True)
    out = jax.block_until_ready(out)

    ref = _reference(x, conv1_w, bn1, conv2_w, bn2, shortcut=True)
    assert out.shape == ref.shape, (out.shape, ref.shape)
    assert jnp.allclose(out, ref, atol=1e-3, rtol=1e-3), \
        float(jnp.max(jnp.abs(out - ref)))

    print("KERNEL_OK")
</pallas_src>

<mosaic_0001>
module attributes {stable_mosaic.version = 11 : i64} {
  func.func @bottleneck_kernel(%arg0: i32, %arg1: memref<1x16x16x8xf32, #tpu.memory_space<vmem>>, %arg2: memref<8x4xf32, #tpu.memory_space<vmem>>, %arg3: memref<1x4xf32, #tpu.memory_space<vmem>>, %arg4: memref<1x4xf32, #tpu.memory_space<vmem>>, %arg5: memref<9x4x8xf32, #tpu.memory_space<vmem>>, %arg6: memref<1x8xf32, #tpu.memory_space<vmem>>, %arg7: memref<1x8xf32, #tpu.memory_space<vmem>>, %arg8: memref<1x16x16x8xf32, #tpu.memory_space<vmem>>, %arg9: memref<18x18x4xf32, #tpu.memory_space<vmem>>) attributes {dimension_semantics = [#tpu.dimension_semantics<parallel>], iteration_bounds = array<i64: 2>, scalar_prefetch = 0 : i64, scratch_operands = 1 : i64, tpu.core_type = #tpu.core_type<tc>, window_params = [{transform_indices = @transform_0, window_bounds = array<i64: 1, 16, 16, 8>}, {pipeline_mode = #tpu.pipeline_mode<synchronous>, transform_indices = @transform_1, window_bounds = array<i64: 8, 4>}, {pipeline_mode = #tpu.pipeline_mode<synchronous>, transform_indices = @transform_2, window_bounds = array<i64: 1, 4>}, {pipeline_mode = #tpu.pipeline_mode<synchronous>, transform_indices = @transform_3, window_bounds = array<i64: 1, 4>}, {pipeline_mode = #tpu.pipeline_mode<synchronous>, transform_indices = @transform_4, window_bounds = array<i64: 9, 4, 8>}, {pipeline_mode = #tpu.pipeline_mode<synchronous>, transform_indices = @transform_5, window_bounds = array<i64: 1, 8>}, {pipeline_mode = #tpu.pipeline_mode<synchronous>, transform_indices = @transform_6, window_bounds = array<i64: 1, 8>}, {transform_indices = @transform_7, window_bounds = array<i64: 1, 16, 16, 8>}]} {
    %c0 = arith.constant 0 : index
    %c0_0 = arith.constant 0 : index
    %c0_1 = arith.constant 0 : index
    %c0_2 = arith.constant 0 : index
    %0 = vector.load %arg1[%c0, %c0_0, %c0_1, %c0_2] : memref<1x16x16x8xf32, #tpu.memory_space<vmem>>, vector<1x16x16x8xf32>
    %1 = vector.shape_cast %0 : vector<1x16x16x8xf32> to vector<16x16x8xf32>
    %2 = vector.shape_cast %1 : vector<16x16x8xf32> to vector<256x8xf32>
    %c0_3 = arith.constant 0 : index
    %c0_4 = arith.constant 0 : index
    %3 = vector.load %arg2[%c0_3, %c0_4] : memref<8x4xf32, #tpu.memory_space<vmem>>, vector<8x4xf32>
    %cst = arith.constant dense<0.000000e+00> : vector<256x4xf32>
    %4 = tpu.matmul %2, %3, %cst {dimension_numbers = #tpu.dot_dimension_numbers<[1], [0], [0], [1], [0, 0, 1, 1], [], []>} : vector<256x8xf32>, vector<8x4xf32>, vector<256x4xf32> -> vector<256x4xf32>
    %c0_5 = arith.constant 0 : index
    %c0_6 = arith.constant 0 : index
    %5 = vector.load %arg3[%c0_5, %c0_6] : memref<1x4xf32, #tpu.memory_space<vmem>>, vector<1x4xf32>
    %6 = vector.broadcast %5 : vector<1x4xf32> to vector<256x4xf32>
    %7 = arith.mulf %4, %6 : vector<256x4xf32>
    %c0_7 = arith.constant 0 : index
    %c0_8 = arith.constant 0 : index
    %8 = vector.load %arg4[%c0_7, %c0_8] : memref<1x4xf32, #tpu.memory_space<vmem>>, vector<1x4xf32>
    %9 = vector.broadcast %8 : vector<1x4xf32> to vector<256x4xf32>
    %10 = arith.addf %7, %9 : vector<256x4xf32>
    %cst_9 = arith.constant 0.000000e+00 : f32
    %11 = vector.broadcast %cst_9 : f32 to vector<256x4xf32>
    %12 = arith.maximumf %10, %11 : vector<256x4xf32>
    %13 = vector.shape_cast %12 : vector<256x4xf32> to vector<16x16x4xf32>
    %cst_10 = arith.constant 0.000000e+00 : f32
    %14 = vector.broadcast %cst_10 : f32 to vector<18x18x4xf32>
    %c0_11 = arith.constant 0 : index
    %c0_12 = arith.constant 0 : index
    %c0_13 = arith.constant 0 : index
    %15 = vector.load %arg9[%c0_11, %c0_12, %c0_13] : memref<18x18x4xf32, #tpu.memory_space<vmem>>, vector<18x18x4xf32>
    tpu.vector_store %arg9[%c0_11, %c0_12, %c0_13], %14 {strides = array<i32>} : memref<18x18x4xf32, #tpu.memory_space<vmem>>, vector<18x18x4xf32>,
    %c1 = arith.constant 1 : index
    %c1_14 = arith.constant 1 : index
    %c0_15 = arith.constant 0 : index
    %16 = vector.load %arg9[%c1, %c1_14, %c0_15] : memref<18x18x4xf32, #tpu.memory_space<vmem>>, vector<16x16x4xf32>
    tpu.vector_store %arg9[%c1, %c1_14, %c0_15], %13 {strides = array<i32>} : memref<18x18x4xf32, #tpu.memory_space<vmem>>, vector<16x16x4xf32>,
    %cst_16 = arith.constant 0.000000e+00 : f32
    %17 = vector.broadcast %cst_16 : f32 to vector<256x8xf32>
    %c0_17 = arith.constant 0 : index
    %c0_18 = arith.constant 0 : index
    %c0_19 = arith.constant 0 : index
    %18 = vector.load %arg9[%c0_17, %c0_18, %c0_19] : memref<18x18x4xf32, #tpu.memory_space<vmem>>, vector<16x16x4xf32>
    %19 = vector.shape_cast %18 : vector<16x16x4xf32> to vector<256x4xf32>
    %c0_20 = arith.constant 0 : index
    %c0_21 = arith.constant 0 : index
    %c0_22 = arith.constant 0 : index
    %20 = vector.load %arg5[%c0_20, %c0_21, %c0_22] : memref<9x4x8xf32, #tpu.memory_space<vmem>>, vector<1x4x8xf32>
    %21 = vector.shape_cast %20 : vector<1x4x8xf32> to vector<4x8xf32>
    %cst_23 = arith.constant dense<0.000000e+00> : vector<256x8xf32>
    %22 = tpu.matmul %19, %21, %cst_23 {dimension_numbers = #tpu.dot_dimension_numbers<[1], [0], [0], [1], [0, 0, 1, 1], [], []>} : vector<256x4xf32>, vector<4x8xf32>, vector<256x8xf32> -> vector<256x8xf32>
    %23 = arith.addf %17, %22 : vector<256x8xf32>
    %c0_24 = arith.constant 0 : index
    %c1_25 = arith.constant 1 : index
    %c0_26 = arith.constant 0 : index
    %24 = vector.load %arg9[%c0_24, %c1_25, %c0_26] : memref<18x18x4xf32, #tpu.memory_space<vmem>>, vector<16x16x4xf32>
    %25 = vector.shape_cast %24 : vector<16x16x4xf32> to vector<256x4xf32>
    %c1_27 = arith.constant 1 : index
    %c0_28 = arith.constant 0 : index
    %c0_29 = arith.constant 0 : index
    %26 = vector.load %arg5[%c1_27, %c0_28, %c0_29] : memref<9x4x8xf32, #tpu.memory_space<vmem>>, vector<1x4x8xf32>
    %27 = vector.shape_cast %26 : vector<1x4x8xf32> to vector<4x8xf32>
    %cst_30 = arith.constant dense<0.000000e+00> : vector<256x8xf32>
    %28 = tpu.matmul %25, %27, %cst_30 {dimension_numbers = #tpu.dot_dimension_numbers<[1], [0], [0], [1], [0, 0, 1, 1], [], []>} : vector<256x4xf32>, vector<4x8xf32>, vector<256x8xf32> -> vector<256x8xf32>
    %29 = arith.addf %23, %28 : vector<256x8xf32>
    %c0_31 = arith.constant 0 : index
    %c2 = arith.constant 2 : index
    %c0_32 = arith.constant 0 : index
    %30 = vector.load %arg9[%c0_31, %c2, %c0_32] : memref<18x18x4xf32, #tpu.memory_space<vmem>>, vector<16x16x4xf32>
    %31 = vector.shape_cast %30 : vector<16x16x4xf32> to vector<256x4xf32>
    %c2_33 = arith.constant 2 : index
    %c0_34 = arith.constant 0 : index
    %c0_35 = arith.constant 0 : index
    %32 = vector.load %arg5[%c2_33, %c0_34, %c0_35] : memref<9x4x8xf32, #tpu.memory_space<vmem>>, vector<1x4x8xf32>
    %33 = vector.shape_cast %32 : vector<1x4x8xf32> to vector<4x8xf32>
    %cst_36 = arith.constant dense<0.000000e+00> : vector<256x8xf32>
    %34 = tpu.matmul %31, %33, %cst_36 {dimension_numbers = #tpu.dot_dimension_numbers<[1], [0], [0], [1], [0, 0, 1, 1], [], []>} : vector<256x4xf32>, vector<4x8xf32>, vector<256x8xf32> -> vector<256x8xf32>
    %35 = arith.addf %29, %34 : vector<256x8xf32>
    %c1_37 = arith.constant 1 : index
    %c0_38 = arith.constant 0 : index
    %c0_39 = arith.constant 0 : index
    %36 = vector.load %arg9[%c1_37, %c0_38, %c0_39] : memref<18x18x4xf32, #tpu.memory_space<vmem>>, vector<16x16x4xf32>
    %37 = vector.shape_cast %36 : vector<16x16x4xf32> to vector<256x4xf32>
    %c3 = arith.constant 3 : index
    %c0_40 = arith.constant 0 : index
    %c0_41 = arith.constant 0 : index
    %38 = vector.load %arg5[%c3, %c0_40, %c0_41] : memref<9x4x8xf32, #tpu.memory_space<vmem>>, vector<1x4x8xf32>
    %39 = vector.shape_cast %38 : vector<1x4x8xf32> to vector<4x8xf32>
    %cst_42 = arith.constant dense<0.000000e+00> : vector<256x8xf32>
    %40 = tpu.matmul %37, %39, %cst_42 {dimension_numbers = #tpu.dot_dimension_numbers<[1], [0], [0], [1], [0, 0, 1, 1], [], []>} : vector<256x4xf32>, vector<4x8xf32>, vector<256x8xf32> -> vector<256x8xf32>
    %41 = arith.addf %35, %40 : vector<256x8xf32>
    %c1_43 = arith.constant 1 : index
    %c1_44 = arith.constant 1 : index
    %c0_45 = arith.constant 0 : index
    %42 = vector.load %arg9[%c1_43, %c1_44, %c0_45] : memref<18x18x4xf32, #tpu.memory_space<vmem>>, vector<16x16x4xf32>
    %43 = vector.shape_cast %42 : vector<16x16x4xf32> to vector<256x4xf32>
    %c4 = arith.constant 4 : index
    %c0_46 = arith.constant 0 : index
    %c0_47 = arith.constant 0 : index
    %44 = vector.load %arg5[%c4, %c0_46, %c0_47] : memref<9x4x8xf32, #tpu.memory_space<vmem>>, vector<1x4x8xf32>
    %45 = vector.shape_cast %44 : vector<1x4x8xf32> to vector<4x8xf32>
    %cst_48 = arith.constant dense<0.000000e+00> : vector<256x8xf32>
    %46 = tpu.matmul %43, %45, %cst_48 {dimension_numbers = #tpu.dot_dimension_numbers<[1], [0], [0], [1], [0, 0, 1, 1], [], []>} : vector<256x4xf32>, vector<4x8xf32>, vector<256x8xf32> -> vector<256x8xf32>
    %47 = arith.addf %41, %46 : vector<256x8xf32>
    %c1_49 = arith.constant 1 : index
    %c2_50 = arith.constant 2 : index
    %c0_51 = arith.constant 0 : index
    %48 = vector.load %arg9[%c1_49, %c2_50, %c0_51] : memref<18x18x4xf32, #tpu.memory_space<vmem>>, vector<16x16x4xf32>
    %49 = vector.shape_cast %48 : vector<16x16x4xf32> to vector<256x4xf32>
    %c5 = arith.constant 5 : index
    %c0_52 = arith.constant 0 : index
    %c0_53 = arith.constant 0 : index
    %50 = vector.load %arg5[%c5, %c0_52, %c0_53] : memref<9x4x8xf32, #tpu.memory_space<vmem>>, vector<1x4x8xf32>
    %51 = vector.shape_cast %50 : vector<1x4x8xf32> to vector<4x8xf32>
    %cst_54 = arith.constant dense<0.000000e+00> : vector<256x8xf32>
    %52 = tpu.matmul %49, %51, %cst_54 {dimension_numbers = #tpu.dot_dimension_numbers<[1], [0], [0], [1], [0, 0, 1, 1], [], []>} : vector<256x4xf32>, vector<4x8xf32>, vector<256x8xf32> -> vector<256x8xf32>
    %53 = arith.addf %47, %52 : vector<256x8xf32>
    %c2_55 = arith.constant 2 : index
    %c0_56 = arith.constant 0 : index
    %c0_57 = arith.constant 0 : index
    %54 = vector.load %arg9[%c2_55, %c0_56, %c0_57] : memref<18x18x4xf32, #tpu.memory_space<vmem>>, vector<16x16x4xf32>
    %55 = vector.shape_cast %54 : vector<16x16x4xf32> to vector<256x4xf32>
    %c6 = arith.constant 6 : index
    %c0_58 = arith.constant 0 : index
    %c0_59 = arith.constant 0 : index
    %56 = vector.load %arg5[%c6, %c0_58, %c0_59] : memref<9x4x8xf32, #tpu.memory_space<vmem>>, vector<1x4x8xf32>
    %57 = vector.shape_cast %56 : vector<1x4x8xf32> to vector<4x8xf32>
    %cst_60 = arith.constant dense<0.000000e+00> : vector<256x8xf32>
    %58 = tpu.matmul %55, %57, %cst_60 {dimension_numbers = #tpu.dot_dimension_numbers<[1], [0], [0], [1], [0, 0, 1, 1], [], []>} : vector<256x4xf32>, vector<4x8xf32>, vector<256x8xf32> -> vector<256x8xf32>
    %59 = arith.addf %53, %58 : vector<256x8xf32>
    %c2_61 = arith.constant 2 : index
    %c1_62 = arith.constant 1 : index
    %c0_63 = arith.constant 0 : index
    %60 = vector.load %arg9[%c2_61, %c1_62, %c0_63] : memref<18x18x4xf32, #tpu.memory_space<vmem>>, vector<16x16x4xf32>
    %61 = vector.shape_cast %60 : vector<16x16x4xf32> to vector<256x4xf32>
    %c7 = arith.constant 7 : index
    %c0_64 = arith.constant 0 : index
    %c0_65 = arith.constant 0 : index
    %62 = vector.load %arg5[%c7, %c0_64, %c0_65] : memref<9x4x8xf32, #tpu.memory_space<vmem>>, vector<1x4x8xf32>
    %63 = vector.shape_cast %62 : vector<1x4x8xf32> to vector<4x8xf32>
    %cst_66 = arith.constant dense<0.000000e+00> : vector<256x8xf32>
    %64 = tpu.matmul %61, %63, %cst_66 {dimension_numbers = #tpu.dot_dimension_numbers<[1], [0], [0], [1], [0, 0, 1, 1], [], []>} : vector<256x4xf32>, vector<4x8xf32>, vector<256x8xf32> -> vector<256x8xf32>
    %65 = arith.addf %59, %64 : vector<256x8xf32>
    %c2_67 = arith.constant 2 : index
    %c2_68 = arith.constant 2 : index
    %c0_69 = arith.constant 0 : index
    %66 = vector.load %arg9[%c2_67, %c2_68, %c0_69] : memref<18x18x4xf32, #tpu.memory_space<vmem>>, vector<16x16x4xf32>
    %67 = vector.shape_cast %66 : vector<16x16x4xf32> to vector<256x4xf32>
    %c8 = arith.constant 8 : index
    %c0_70 = arith.constant 0 : index
    %c0_71 = arith.constant 0 : index
    %68 = vector.load %arg5[%c8, %c0_70, %c0_71] : memref<9x4x8xf32, #tpu.memory_space<vmem>>, vector<1x4x8xf32>
    %69 = vector.shape_cast %68 : vector<1x4x8xf32> to vector<4x8xf32>
    %cst_72 = arith.constant dense<0.000000e+00> : vector<256x8xf32>
    %70 = tpu.matmul %67, %69, %cst_72 {dimension_numbers = #tpu.dot_dimension_numbers<[1], [0], [0], [1], [0, 0, 1, 1], [], []>} : vector<256x4xf32>, vector<4x8xf32>, vector<256x8xf32> -> vector<256x8xf32>
    %71 = arith.addf %65, %70 : vector<256x8xf32>
    %c0_73 = arith.constant 0 : index
    %c0_74 = arith.constant 0 : index
    %72 = vector.load %arg6[%c0_73, %c0_74] : memref<1x8xf32, #tpu.memory_space<vmem>>, vector<1x8xf32>
    %73 = vector.broadcast %72 : vector<1x8xf32> to vector<256x8xf32>
    %74 = arith.mulf %71, %73 : vector<256x8xf32>
    %c0_75 = arith.constant 0 : index
    %c0_76 = arith.constant 0 : index
    %75 = vector.load %arg7[%c0_75, %c0_76] : memref<1x8xf32, #tpu.memory_space<vmem>>, vector<1x8xf32>
    %76 = vector.broadcast %75 : vector<1x8xf32> to vector<256x8xf32>
    %77 = arith.addf %74, %76 : vector<256x8xf32>
    %78 = vector.shape_cast %77 : vector<256x8xf32> to vector<16x16x8xf32>
    %79 = arith.addf %78, %1 : vector<16x16x8xf32>
    %cst_77 = arith.constant 0.000000e+00 : f32
    %80 = vector.broadcast %cst_77 : f32 to vector<16x16x8xf32>
    %81 = arith.maximumf %79, %80 : vector<16x16x8xf32>
    %c0_78 = arith.constant 0 : index
    %c0_79 = arith.constant 0 : index
    %c0_80 = arith.constant 0 : index
    %c0_81 = arith.constant 0 : index
    %82 = vector.load %arg8[%c0_78, %c0_79, %c0_80, %c0_81] : memref<1x16x16x8xf32, #tpu.memory_space<vmem>>, vector<1x16x16x8xf32>
    %83 = vector.shape_cast %82 : vector<1x16x16x8xf32> to vector<16x16x8xf32>
    %84 = vector.shape_cast %81 : vector<16x16x8xf32> to vector<1x16x16x8xf32>
    tpu.vector_store %arg8[%c0_78, %c0_79, %c0_80, %c0_81], %84 {strides = array<i32>} : memref<1x16x16x8xf32, #tpu.memory_space<vmem>>, vector<1x16x16x8xf32>,
    return
  }
  func.func @transform_0(%arg0: i32) -> (i32, i32, i32, i32) {
    %c0_i32 = arith.constant 0 : i32
    %c0_i32_0 = arith.constant 0 : i32
    %c0_i32_1 = arith.constant 0 : i32
    %c0_i32_2 = arith.constant 0 : i32
    return %arg0, %c0_i32, %c0_i32_0, %c0_i32_1 : i32, i32, i32, i32
  }
  func.func @transform_1(%arg0: i32) -> (i32, i32) {
    %c0_i32 = arith.constant 0 : i32
    %c0_i32_0 = arith.constant 0 : i32
    %c0_i32_1 = arith.constant 0 : i32
    return %c0_i32, %c0_i32_0 : i32, i32
  }
  func.func @transform_2(%arg0: i32) -> (i32, i32) {
    %c0_i32 = arith.constant 0 : i32
    %c0_i32_0 = arith.constant 0 : i32
    %c0_i32_1 = arith.constant 0 : i32
    return %c0_i32, %c0_i32_0 : i32, i32
  }
  func.func @transform_3(%arg0: i32) -> (i32, i32) {
    %c0_i32 = arith.constant 0 : i32
    %c0_i32_0 = arith.constant 0 : i32
    %c0_i32_1 = arith.constant 0 : i32
    return %c0_i32, %c0_i32_0 : i32, i32
  }
  func.func @transform_4(%arg0: i32) -> (i32, i32, i32) {
    %c0_i32 = arith.constant 0 : i32
    %c0_i32_0 = arith.constant 0 : i32
    %c0_i32_1 = arith.constant 0 : i32
    %c0_i32_2 = arith.constant 0 : i32
    return %c0_i32, %c0_i32_0, %c0_i32_1 : i32, i32, i32
  }
  func.func @transform_5(%arg0: i32) -> (i32, i32) {
    %c0_i32 = arith.constant 0 : i32
    %c0_i32_0 = arith.constant 0 : i32
    %c0_i32_1 = arith.constant 0 : i32
    return %c0_i32, %c0_i32_0 : i32, i32
  }
  func.func @transform_6(%arg0: i32) -> (i32, i32) {
    %c0_i32 = arith.constant 0 : i32
    %c0_i32_0 = arith.constant 0 : i32
    %c0_i32_1 = arith.constant 0 : i32
    return %c0_i32, %c0_i32_0 : i32, i32
  }
  func.func @transform_7(%arg0: i32) -> (i32, i32, i32, i32) {
    %c0_i32 = arith.constant 0 : i32
    %c0_i32_0 = arith.constant 0 : i32
    %c0_i32_1 = arith.constant 0 : i32
    %c0_i32_2 = arith.constant 0 : i32
    return %arg0, %c0_i32, %c0_i32_0, %c0_i32_1 : i32, i32, i32, i32
  }
}

</mosaic_0001>

<bundles_post_ra>
// kernel: tpu_custom_call.1
= control target key start
LH: loop header
LB: loop body
LE: loop exit
PB: predicated region body
PF: predicated region fallthrough
CT: control target
= control target key end

     0   :  { %12 = vsyncpa [#allocation4], 0  ;;  %s8204_s0 = inlined_call_operand.hbm [shape: f32[2,16,16,8], index: 0, kind: input, shape index: {}]   ;;  %s8205_s1 = inlined_call_operand.hbm [shape: f32[8,4], index: 1, kind: input, shape index: {}]   ;;  %s8206_s2 = inlined_call_operand.hbm [shape: f32[1,4], index: 2, kind: input, shape index: {}]   ;;  %s8207_s3 = inlined_call_operand.hbm [shape: f32[1,4], index: 3, kind: input, shape index: {}]   ;;  %s8208_s4 = inlined_call_operand.hbm [shape: f32[9,4,8], index: 4, kind: input, shape index: {}]   ;;  %s8209_s5 = inlined_call_operand.hbm [shape: f32[1,8], index: 5, kind: input, shape index: {}]   ;;  %s8210_s6 = inlined_call_operand.hbm [shape: f32[1,8], index: 6, kind: input, shape index: {}]   ;;  %s8211_s7 = inlined_call_operand.hbm [shape: f32[2,16,16,8], index: 7, kind: output, shape index: {}]  }
   0x1   :  { %14 = vsyncpa [#allocation4 + $0x1], 0 }
   0x2   :  { %15 = vsyncpa [#allocation7], 0 }
   0x3   :  { %16 = vsyncpa [#allocation10], 0 }
   0x4   :  { %17 = vsyncpa [#allocation13], 0 }
   0x5   :  { %18 = vsyncpa [#allocation5], 0 }
   0x6   :  { %20 = vsyncpa [#allocation5 + $0x1], 0  ;;  %s6619_s24 = smov 0   ;;  %s6621_s25 = smov 0  }
   0x7   :  { %s6623_s26 = smov 0   ;;  %s6625_s27 = smov 0  }
   0x8 LB: > { %s6564_s28 = smov [#allocation6]   ;;  %s6640_s30 = sadd.s32 4294967295, %s6562_s27   ;;  %s6562_s27 = sphi %s6625_s27, %s8342_s27   ;;  %s6558_s26 = sphi %s6623_s26, %s8341_s26   ;;  %s6554_s25 = sphi %s6621_s25, %s8340_s25   ;;  %s6550_s24 = sphi %s6619_s24, %s8339_s24  }
   0x9   : > { %s222_s29 = sshll.u32 %s6564_s28, 4  ;;  %p4694_p0 = scmp.ge.s32.totalorder %s6562_s27, 1  ;;  %s6645_s29 = int_to_ptr.vmem [resolvable:$true] %s222_s29 }
   0xa   : > { %p8212_p1 = scmp.eq.s32.totalorder %s6640_s30, 0  ;;  %p209_p2 = scmp.lt.s32.totalorder %s6562_s27, 3 }
   0xb   : > { %s6565_s9 = smov [#allocation9]   ;;  %s6566_s11 = smov [#allocation12]  }
   0xc   : > { %p6647_p3 = pnand %p4694_p0, %p209_p2  ;;  %s244_s10 = sshll.u32 %s6565_s9, 4  ;;  %s6654_s10 = int_to_ptr.vmem [resolvable:$true] %s244_s10 }
   0xd   : > { %s268_s12 = sshll.u32 %s6566_s11, 4  ;;  %s6567_s14 = smov [#allocation8]   ;;  %s6662_s12 = int_to_ptr.vmem [resolvable:$true] %s268_s12 }
   0xe   : > { %s8250_s8 = scalar_select %p6647_p3, 1, 0 }
   0xf   : > { %p6168_p5 = pneg %p6647_p3  ;;  %s6664_s15 = sshll.u32 %s6567_s14, 4  ;;  %s234_s15 = int_to_ptr.vmem [resolvable:$true] %s6664_s15 }
  0x10   : > { %s6286_s18 = scalar_lea.hbm %s8205_s1, 128 }
  0x11   : > { %p6658_p6 = pnand %p6168_p5, %p8212_p1  ;;  %p6287_p7 = scmp.ne.s32.totalorder %s8205_s1, %s6286_s18 }
  0x12   : > { %p6293_p11 = scmp.lt.u32.totalorder %s6286_s18, %s8205_s1 }
  0x13   : > { %p6674_p8 = pneg %p6658_p6 }
  0x15   : > { %p6289_p9 = pnand %p6674_p8, %p6287_p7 }
  0x17   : > { %p6290_p10 = pneg %p6289_p9 }
  0x19   : > { %p6295_p12 = pnand %p6293_p11, %p6290_p10 }
  0x1b   : > { %6298 = shalt.err (!%p6295_p12)
}
  0x1c   : > { %s6299_s28 = scalar_lea.vmem %s6645_s29, 128  ;;  %p6307_p5 = scmp.lt.s32.totalorder %s6645_s29, %s6645_s29 }
  0x1d   : > { %p6300_p13 = scmp.ne.s32.totalorder %s6645_s29, %s6299_s28  ;;  %p6308_p4 = scmp.lt.s32.totalorder %s6299_s28, %s6299_s28 }
  0x1f   : > { %p6302_p0 = pnand %p6300_p13, %p6674_p8  ;;  %p6309_p7 = por %p6308_p4, %p6307_p5 }
  0x21   : > { %p6303_p2 = pneg %p6302_p0 }
  0x23   : > { %p6310_p9 = pnand %p6309_p7, %p6303_p2 }
  0x25   : > { %6313 = shalt.err (!%p6310_p9)
}
  0x26   : > { %6171 = dma.hbm_to_vmem [thread:$0]  (!%p6658_p6), %s8205_s1, 128, %s6645_s29, [#allocation7]  }
  0x27   : > { %s6314_s17 = scalar_lea.hbm %s8207_s3, 16 }
  0x28   : > { %p6315_p10 = scmp.ne.s32.totalorder %s8207_s3, %s6314_s17  ;;  %p6321_p12 = scmp.lt.u32.totalorder %s6314_s17, %s8207_s3 }
  0x2a   : > { %p6317_p4 = pnand %p6315_p10, %p6674_p8 }
  0x2c   : > { %p6318_p11 = pneg %p6317_p4 }
  0x2e   : > { %p6323_p13 = pnand %p6321_p12, %p6318_p11 }
  0x30   : > { %6326 = shalt.err (!%p6323_p13)
}
  0x31   : > { %s6327_s29 = scalar_lea.vmem %s6654_s10, 16  ;;  %s6334_s23 = scalar_lea.vmem %s6654_s10, 32 }
  0x32   : > { %p6328_p0 = scmp.ne.s32.totalorder %s6654_s10, %s6327_s29  ;;  %p6335_p7 = scmp.lt.s32.totalorder %s6654_s10, %s6654_s10 }
  0x33   : > { %p6336_p9 = scmp.lt.s32.totalorder %s6334_s23, %s6327_s29 }
  0x34   : > { %p6330_p2 = pnand %p6328_p0, %p6674_p8 }
  0x35   : > { %p6337_p10 = por %p6336_p9, %p6335_p7 }
  0x36   : > { %p6331_p5 = pneg %p6330_p2 }
  0x38   : > { %p6338_p4 = pnand %p6337_p10, %p6331_p5 }
  0x3a   : > { %6341 = shalt.err (!%p6338_p4)
}
  0x3b   : > { %6177 = dma.hbm_to_vmem [thread:$0]  (!%p6658_p6), %s8207_s3, 16, %s6654_s10, [#allocation10]  }
  0x3c   : > { %s6342_s16 = scalar_lea.hbm %s8209_s5, 16 }
  0x3d   : > { %p6343_p11 = scmp.ne.s32.totalorder %s8209_s5, %s6342_s16  ;;  %p6349_p0 = scmp.lt.u32.totalorder %s6342_s16, %s8209_s5 }
  0x3f   : > { %p6345_p12 = pnand %p6343_p11, %p6674_p8 }
  0x41   : > { %p6346_p13 = pneg %p6345_p12 }
  0x43   : > { %p6351_p2 = pnand %p6349_p0, %p6346_p13 }
  0x45   : > { %6354 = shalt.err (!%p6351_p2)
}
  0x46   : > { %s6355_s10 = scalar_lea.vmem %s6662_s12, 16  ;;  %s6362_s22 = scalar_lea.vmem %s6662_s12, 32 }
  0x47   : > { %p6356_p5 = scmp.ne.s32.totalorder %s6662_s12, %s6355_s10  ;;  %p6363_p10 = scmp.lt.s32.totalorder %s6662_s12, %s6662_s12 }
  0x48   : > { %p6364_p4 = scmp.lt.s32.totalorder %s6362_s22, %s6355_s10 }
  0x49   : > { %p6358_p7 = pnand %p6356_p5, %p6674_p8 }
  0x4a   : > { %p6365_p11 = por %p6364_p4, %p6363_p10 }
  0x4b   : > { %p6359_p9 = pneg %p6358_p7 }
  0x4d   : > { %p6366_p12 = pnand %p6365_p11, %p6359_p9 }
  0x4f   : > { %6369 = shalt.err (!%p6366_p12)
}
  0x50   : > { %6183 = dma.hbm_to_vmem [thread:$0]  (!%p6658_p6), %s8209_s5, 16, %s6662_s12, [#allocation13]  }
  0x51   : > { %s6568_s28 = smov [#allocation11]   ;;  %s6370_s16 = scalar_lea.hbm %s8206_s2, 16 }
  0x52   : > { %s254_s9 = sshll.u32 %s6568_s28, 4  ;;  %p6371_p13 = scmp.ne.s32.totalorder %s8206_s2, %s6370_s16  ;;  %s255_s9 = int_to_ptr.vmem [resolvable:$true] %s254_s9 }
  0x53   : > { %p6377_p5 = scmp.lt.u32.totalorder %s6370_s16, %s8206_s2 }
  0x54   : > { %p6373_p0 = pnand %p6371_p13, %p6674_p8 }
  0x56   : > { %p6374_p2 = pneg %p6373_p0 }
  0x58   : > { %p6379_p7 = pnand %p6377_p5, %p6374_p2 }
  0x5a   : > { %6382 = shalt.err (!%p6379_p7)
}
  0x5b   : > { %s6383_s12 = scalar_lea.vmem %s234_s15, 16  ;;  %s6390_s10 = scalar_lea.vmem %s234_s15, 32 }
  0x5c   : > { %p6384_p9 = scmp.ne.s32.totalorder %s234_s15, %s6383_s12  ;;  %p6391_p11 = scmp.lt.s32.totalorder %s234_s15, %s234_s15 }
  0x5d   : > { %p6392_p12 = scmp.lt.s32.totalorder %s6390_s10, %s6383_s12 }
  0x5e   : > { %p6386_p10 = pnand %p6384_p9, %p6674_p8 }
  0x5f   : > { %p6393_p1 = por %p6392_p12, %p6391_p11 }
  0x60   : > { %p6387_p4 = pneg %p6386_p10 }
  0x62   : > { %p6394_p3 = pnand %p6393_p1, %p6387_p4 }
  0x64   : > { %6397 = shalt.err (!%p6394_p3)
}
  0x65   : > { %6174 = dma.hbm_to_vmem [thread:$0]  (!%p6658_p6), %s8206_s2, 16, %s234_s15, [#allocation7]  }
  0x66   : > { %s6398_s11 = scalar_lea.hbm %s8208_s4, 576 }
  0x67   : > { %p6399_p13 = scmp.ne.s32.totalorder %s8208_s4, %s6398_s11  ;;  %p6405_p3 = scmp.lt.u32.totalorder %s6398_s11, %s8208_s4 }
  0x69   : > { %p6401_p0 = pnand %p6399_p13, %p6674_p8 }
  0x6b   : > { %p6402_p1 = pneg %p6401_p0 }
  0x6d   : > { %p6407_p2 = pnand %p6405_p3, %p6402_p1 }
  0x6f   : > { %6410 = shalt.err (!%p6407_p2)
}
  0x70   : > { %s6411_s19 = scalar_lea.vmem %s255_s9, 576  ;;  %p6419_p10 = scmp.lt.s32.totalorder %s255_s9, %s255_s9 }
  0x71   : > { %p6412_p5 = scmp.ne.s32.totalorder %s255_s9, %s6411_s19  ;;  %p6420_p4 = scmp.lt.s32.totalorder %s6411_s19, %s6411_s19 }
  0x73   : > { %p6414_p7 = pnand %p6412_p5, %p6674_p8  ;;  %p6421_p11 = por %p6420_p4, %p6419_p10 }
  0x75   : > { %p6415_p9 = pneg %p6414_p7 }
  0x77   : > { %p6422_p12 = pnand %p6421_p11, %p6415_p9 }
  0x79   : > { %6425 = shalt.err (!%p6422_p12)
}
  0x7a   : > { %s6569_s15 = smov 64   ;;  %s6570_s20 = smov 4  }
  0x7b   : > { %6180 = dma.hbm_to_vmem [thread:$0]  (!%p6658_p6), %s8208_s4, 576, %s255_s9, [#allocation10], %s6569_s15, %s6569_s15, %s6570_s20  }
  0x7c   : > { %s6571_s22 = smov [#allocation14]   ;;  %s6426_s11 = scalar_lea.hbm %s8210_s6, 16 }
  0x7d   : > { %s279_s29 = sshll.u32 %s6571_s22, 4  ;;  %p6427_p13 = scmp.ne.s32.totalorder %s8210_s6, %s6426_s11  ;;  %s280_s29 = int_to_ptr.vmem [resolvable:$true] %s279_s29 }
  0x7e   : > { %p6433_p3 = scmp.lt.u32.totalorder %s6426_s11, %s8210_s6 }
  0x7f   : > { %p6429_p0 = pnand %p6427_p13, %p6674_p8 }
  0x81   : > { %p6430_p1 = pneg %p6429_p0 }
  0x83   : > { %p6435_p2 = pnand %p6433_p3, %p6430_p1 }
  0x85   : > { %6438 = shalt.err (!%p6435_p2)
}
  0x86   : > { %s6439_s9 = scalar_lea.vmem %s280_s29, 16  ;;  %s6446_s19 = scalar_lea.vmem %s280_s29, 32 }
  0x87   : > { %p6440_p5 = scmp.ne.s32.totalorder %s280_s29, %s6439_s9  ;;  %p6447_p10 = scmp.lt.s32.totalorder %s280_s29, %s280_s29 }
  0x88   : > { %p6448_p4 = scmp.lt.s32.totalorder %s6446_s19, %s6439_s9 }
  0x89   : > { %p6442_p7 = pnand %p6440_p5, %p6674_p8 }
  0x8a   : > { %p6449_p11 = por %p6448_p4, %p6447_p10 }
  0x8b   : > { %p6443_p9 = pneg %p6442_p7 }
  0x8d   : > { %p6450_p12 = pnand %p6449_p11, %p6443_p9 }
  0x8f   : > { %6453 = shalt.err (!%p6450_p12)
}
  0x90   : > { %6186 = dma.hbm_to_vmem [thread:$0]  (!%p6658_p6), %s8210_s6, 16, %s280_s29, [#allocation13]  }
  0x91   : > { %s4693_s21 = sadd.s32 4294967294, %s6562_s27   ;;  %s6800_s13 = sadd.s32 1, %s6562_s27  }
  0x92   : > { %s30_s12 = ssub.s32 %s6562_s27, %s6800_s13  ;;  %s33_s10 = sadd.s32 1, %s6558_s26 }
  0x93   : > { %p31_p8 = scmp.eq.s32.totalorder %s30_s12, 0  ;;  %p40_p13 = scmp.ne.s32.totalorder %s6558_s26, %s6554_s25 }
  0x94   : > { %p41_p0 = scmp.eq.s32.totalorder %s6562_s27, 0  ;;  %p46_p1 = scmp.ne.s32.totalorder %s6554_s25, %s6550_s24 }
  0x95   : > { %s6811_s22 = scalar_select %p31_p8, %s6558_s26, %s33_s10  }
  0x96   : > { %p6813_p3 = por %p41_p0, %p40_p13  ;;  %p8254_p2 = scmp.eq.s32.totalorder %s6640_s30, 0 }
  0x97   : > { %p196_p5 = scmp.eq.s32.totalorder %s6640_s30, 1  ;;  %p202_p7 = scmp.eq.s32.totalorder %s4693_s21, 1 }
  0x98   : > { %p6819_p6 = por %p8254_p2, %p46_p1  ;;  %p6201_p9 = scmp.lt.s32.totalorder %s6562_s27, 2 }
  0x99   : > { %s290_s28 = sand.u32 1, %s6558_s26   ;;  %p6826_p10 = por %p196_p5, %p40_p13 }
  0x9a   : > { %p6830_p4 = por %p202_p7, %p46_p1  ;;  %s4702_s16 = sshll.u32 %s290_s28, 8 }
  0x9b   : > { %s8256_s11 = scalar_select %p6826_p10, 1, 0 }
  0x9c   : > { %s8257_s14 = scalar_select %p6830_p4, 1, 0 }
  0x9d   : > { %s5052_s17 = sshll.u32 %s6562_s27, 12  ;;  %s294_s15 = scalar_lea.vmem [#allocation3], %s4702_s16 }
  0x9e   : > { %s6838_s19 = scalar_lea.hbm %s8204_s0, %s5052_s17  ;;  %s301_s20 = sshll.u32 %s294_s15, 4  ;;  %s6840_s20 = int_to_ptr.vmem [resolvable:$true] %s301_s20 }
  0x9f   : > { %p6844_p11 = pnand %p6201_p9, %p6813_p3  ;;  %s6848_s12 = scalar_lea.sflag [#allocation4], %s290_s28 }
  0xa0   : > { %s6454_s10 = scalar_lea.hbm %s6838_s19, 4096  ;;  %s6459_s23 = scalar_lea.hbm %s8204_s0, 8192 }
  0xa1   : > { %p6455_p12 = scmp.ne.s32.totalorder %s6838_s19, %s6454_s10  ;;  %p6456_p8 = pneg %p6844_p11 }
  0xa2   : > { %p6460_p1 = scmp.lt.u32.totalorder %s6838_s19, %s8204_s0  ;;  %p6461_p3 = scmp.lt.u32.totalorder %s6459_s23, %s6454_s10 }
  0xa3   : > { %p6457_p13 = pnand %p6456_p8, %p6455_p12  ;;  %p6463_p5 = scmp.lt.u32.totalorder %s6454_s10, %s6838_s19 }
  0xa4   : > { %p6462_p2 = por %p6461_p3, %p6460_p1 }
  0xa5   : > { %p6458_p0 = pneg %p6457_p13 }
  0xa6   : > { %p6464_p7 = por %p6463_p5, %p6462_p2 }
  0xa8   : > { %p6465_p9 = pnand %p6464_p7, %p6458_p0 }
  0xaa   : > { %6468 = shalt.err (!%p6465_p9)
}
  0xab   : > { %s6469_s28 = scalar_lea.vmem %s6840_s20, 4096  ;;  %s6572_s15 = smov [#allocation3]  }
  0xac   : > { %p6470_p12 = scmp.ne.s32.totalorder %s6840_s20, %s6469_s28  ;;  %s6474_s16 = sshll.u32 %s6572_s15, 4  ;;  %s6475_s16 = int_to_ptr.vmem [resolvable:$false] %s6474_s16 }
  0xad   : > { %s6476_s17 = scalar_lea.vmem %s6475_s16, 8192  ;;  %p6477_p10 = scmp.lt.s32.totalorder %s6840_s20, %s6475_s16 }
  0xae   : > { %p6472_p13 = pnand %p6470_p12, %p6456_p8  ;;  %p6478_p1 = scmp.lt.s32.totalorder %s6476_s17, %s6469_s28 }
  0xb0   : > { %p6473_p4 = pneg %p6472_p13  ;;  %p6479_p3 = por %p6478_p1, %p6477_p10 }
  0xb2   : > { %p6480_p2 = pnand %p6479_p3, %p6473_p4 }
  0xb4   : > { %6483 = shalt.err (!%p6480_p2)
}
  0xb5   : > { %s6573_s10 = smov 128   ;;  %s6574_s23 = smov 8  }
  0xb6   : > { %6190 = dma.hbm_to_vmem [thread:$0]  (!%p6844_p11), %s6838_s19, 4096, %s6840_s20, %s6848_s12, %s6573_s10, %s6573_s10, %s6574_s23  }
  0xb7   : > { %p8259_p8 = scmp.ne.s32.totalorder %s8250_s8, 0 }
  0xb9   : > { %313 = sbr.rel (%p8259_p8) target bundleno = 991 (0x3df), region = 48 }
  0xc0   : > { %s6879_s18 = sand.u32 1, %s6554_s25  }
  0xc1   : > { %s4706_s9 = sshll.u32 %s6879_s18, 8  ;;  %s316_s28 = scalar_lea.sflag [#allocation4], %s6879_s18 }
  0xc2   : > { %s6885_s15 = scalar_lea.vmem [#allocation3], %s4706_s9 }
  0xc3   : > { %6529 = dma.done.wait (%p6819_p6), %s316_s28, 4096  }
  0xc4   : > { %6531 = vsyncadd (%p6819_p6), %s316_s28, 4294963200  ;;  %p8260_p10 = scmp.eq.s32.totalorder %s6640_s30, 0 }
  0xc6   : > { %6533 = dma.done.wait (%p8260_p10), [#allocation7], 144   ;;  %p8261_p4 = pmov %p8260_p10 }
  0xc8   : > { %6535 = vsyncadd (%p8261_p4), [#allocation7], 4294967152  ;;  %p8262_p11 = pmov %p8261_p4 }
  0xc9   : > { %p8263_p0 = pmov %p8261_p4 }
  0xca   : > { %6537 = dma.done.wait (%p8262_p11), [#allocation10], 592  }
  0xcb   : > { %6539 = vsyncadd (%p8263_p0), [#allocation10], 4294966704  ;;  %p8264_p5 = pmov %p8263_p0 }
  0xcc   : > { %p8265_p7 = pmov %p8263_p0 }
  0xcd   : > { %6541 = dma.done.wait (%p8264_p5), [#allocation13], 32  }
  0xce   : > { %6543 = vsyncadd (%p8265_p7), [#allocation13], 4294967264  ;;  %vm407_vm0 = vcmask 64512   ;;  %v406_v0 = vld [vmem:[#allocation6] sm:$0xff]  ;;  %v375_v2 = vld [vmem:[%s6885_s15 + $0x8] sm:$0xff]  ;;  %vm839_vm1 = vcmask 31744  }
  0xcf   : > { %v374_v1 = vld [vmem:[%s6885_s15] sm:$0xff]  ;;  %5384 = vmatprep.subr.mxu0 %v406_v0  ;;  %v376_v3 = vld [vmem:[%s6885_s15 + $0x10] sm:$0xff]  ;;  %v377_v4 = vld [vmem:[%s6885_s15 + $0x18] sm:$0xff]  ;;  %vm842_vm2 = vcmask 25600   ;;  %v6575_v33 = vmov 0.0   ;;  %vm1091_vm3 = vcmask 1043456  }
  0xd0   : > { %5386 = vmatprep.mubr.msk.f32.mxu0 %vm407_vm0, %v374_v1  ;;  %5385 = vmatpush3.msra.mxu0 %v406_v0  ;;  %v378_v5 = vld [vmem:[%s6885_s15 + $0x20] sm:$0xff]  ;;  %v379_v6 = vld [vmem:[%s6885_s15 + $0x28] sm:$0xff]  ;;  %v380_v7 = vld [vmem:[%s6885_s15 + $0x30] sm:$0xff]  ;;  %845 = vst.msk [vmem:[#allocation2 + $0x20] sm:$0xff] %vm839_vm1, %v6575_v33  ;;  %s7975_s8 = scalar_lea.vmem [#allocation15], %s4706_s9  ;;  %s5053_s29 = sshll.u32 %s6640_s30, 12 }
  0xd1   : > { %5387 = vmatmul.mubr.msk.f32.vlgmr.msra.gmra.mrb[0].mxu0 %vm407_vm0, %v375_v2  ;;  %v381_v8 = vld [vmem:[%s6885_s15 + $0x38] sm:$0xff]  ;;  %v382_v9 = vld [vmem:[%s6885_s15 + $0x40] sm:$0xff]  ;;  %v383_v10 = vld [vmem:[%s6885_s15 + $0x48] sm:$0xff]  ;;  %840 = vst.msk [vmem:[#allocation2] sm:$0xff] %vm839_vm1, %v6575_v33  ;;  %s4563_s19 = sshll.u32 %s7975_s8, 4  ;;  %s8154_s12 = scalar_lea.hbm %s8211_s7, %s5053_s29  ;;  %s8156_s19 = int_to_ptr.vmem [resolvable:$true] %s4563_s19 }
  0xd2   : > { %5389 = vmatprep.mubr.msk.f32.mxu0 %vm407_vm0, %v376_v3  ;;  %v384_v11 = vld [vmem:[%s6885_s15 + $0x50] sm:$0xff]  ;;  %v385_v12 = vld [vmem:[%s6885_s15 + $0x58] sm:$0xff]  ;;  %v386_v13 = vld [vmem:[%s6885_s15 + $0x60] sm:$0xff]  ;;  %841 = vst.msk [vmem:[#allocation2 + $0x8] sm:$0xff] %vm839_vm1, %v6575_v33  ;;  %s4550_s30 = scalar_lea.sflag [#allocation5], %s6879_s18  ;;  %s6484_s16 = scalar_lea.vmem %s8156_s19, 4096 }
  0xd3   : > { %v387_v14 = vld [vmem:[%s6885_s15 + $0x68] sm:$0xff]  ;;  %v388_v15 = vld [vmem:[%s6885_s15 + $0x70] sm:$0xff]  ;;  %v389_v16 = vld [vmem:[%s6885_s15 + $0x78] sm:$0xff]  ;;  %844 = vst.msk [vmem:[#allocation2 + $0x18] sm:$0xff] %vm839_vm1, %v6575_v33  ;;  %p6485_p6 = scmp.ne.s32.totalorder %s8156_s19, %s6484_s16  ;;  %p8336_p9 = scmp.ne.s32.totalorder %s8256_s11, 0 }
  0xd4   : > { %v390_v17 = vld [vmem:[%s6885_s15 + $0x80] sm:$0xff]  ;;  %v391_v18 = vld [vmem:[%s6885_s15 + $0x88] sm:$0xff]  ;;  %v392_v19 = vld [vmem:[%s6885_s15 + $0x90] sm:$0xff]  ;;  %847 = vst.msk [vmem:[#allocation2 + $0x30] sm:$0xff] %vm839_vm1, %v6575_v33  ;;  %s6576_s17 = smov [#allocation15]  }
  0xd5   : > { %5390 = vmatmul.mubr.msk.f32.gmra.mrb[2].mxu0 %vm407_vm0, %v377_v4  ;;  %v393_v20 = vld [vmem:[%s6885_s15 + $0x98] sm:$0xff]  ;;  %v394_v21 = vld [vmem:[%s6885_s15 + $0xa0] sm:$0xff]  ;;  %v395_v22 = vld [vmem:[%s6885_s15 + $0xa8] sm:$0xff]  ;;  %848 = vst.msk [vmem:[#allocation2 + $0x38] sm:$0xff] %vm839_vm1, %v6575_v33  ;;  %p6486_p12 = pnand %p6485_p6, %p8336_p9  ;;  %s6488_s10 = sshll.u32 %s6576_s17, 4  ;;  %s6489_s10 = int_to_ptr.vmem [resolvable:$false] %s6488_s10 }
  0xd6   : > { %5392 = vmatprep.mubr.msk.f32.mxu0 %vm407_vm0, %v378_v5  ;;  %v396_v23 = vld [vmem:[%s6885_s15 + $0xb0] sm:$0xff]  ;;  %v397_v24 = vld [vmem:[%s6885_s15 + $0xb8] sm:$0xff]  ;;  %v398_v25 = vld [vmem:[%s6885_s15 + $0xc0] sm:$0xff]  ;;  %850 = vst.msk [vmem:[#allocation2 + $0x48] sm:$0xff] %vm839_vm1, %v6575_v33  ;;  %s6490_s23 = scalar_lea.vmem %s6489_s10, 8192  ;;  %p6491_p1 = scmp.lt.s32.totalorder %s8156_s19, %s6489_s10 }
  0xd7   : > { %v399_v26 = vld [vmem:[%s6885_s15 + $0xc8] sm:$0xff]  ;;  %v400_v27 = vld [vmem:[%s6885_s15 + $0xd0] sm:$0xff]  ;;  %v401_v28 = vld [vmem:[%s6885_s15 + $0xd8] sm:$0xff]  ;;  %851 = vst.msk [vmem:[#allocation2 + $0x50] sm:$0xff] %vm839_vm1, %v6575_v33  ;;  %p6487_p13 = pneg %p6486_p12  ;;  %p6492_p3 = scmp.lt.s32.totalorder %s6490_s23, %s6484_s16 }
  0xd8   : > { %v402_v29 = vld [vmem:[%s6885_s15 + $0xe0] sm:$0xff]  ;;  %v403_v30 = vld [vmem:[%s6885_s15 + $0xe8] sm:$0xff]  ;;  %v404_v31 = vld [vmem:[%s6885_s15 + $0xf0] sm:$0xff]  ;;  %853 = vst.msk [vmem:[#allocation2 + $0x60] sm:$0xff] %vm839_vm1, %v6575_v33 }
  0xd9   : > { %5393 = vmatmul.mubr.msk.f32.gmra.mrb[4].mxu0 %vm407_vm0, %v379_v6  ;;  %v405_v32 = vld [vmem:[%s6885_s15 + $0xf8] sm:$0xff]  ;;  %854 = vst.msk [vmem:[#allocation2 + $0x68] sm:$0xff] %vm839_vm1, %v6575_v33  ;;  %856 = vst.msk [vmem:[#allocation2 + $0x78] sm:$0xff] %vm839_vm1, %v6575_v33  ;;  %v994_v34 = vld [vmem:[#allocation11 + $0x4] sm:$0xf]  ;;  %p6493_p2 = por %p6492_p3, %p6491_p1 }
  0xda   : > { %5395 = vmatprep.mubr.msk.f32.mxu0 %vm407_vm0, %v380_v7  ;;  %857 = vst.msk [vmem:[#allocation2 + $0x80] sm:$0xff] %vm839_vm1, %v6575_v33  ;;  %859 = vst.msk [vmem:[#allocation2 + $0x90] sm:$0xff] %vm839_vm1, %v6575_v33  ;;  %5434 = vmatprep.subr.msk.mxu0 %vm1091_vm3, %v994_v34  ;;  %v961_v35 = vld [vmem:[#allocation2 + $0x1] sm:$0xff]  ;;  %v2457_v37 = vld [vmem:[#allocation11 + $0x10] sm:$0xf] }
  0xdb   : > { %860 = vst.msk [vmem:[#allocation2 + $0x98] sm:$0xff] %vm839_vm1, %v6575_v33  ;;  %862 = vst.msk [vmem:[#allocation2 + $0xa8] sm:$0xff] %vm839_vm1, %v6575_v33  ;;  %5435 = vmatpush3.msk.msra.mxu0 %vm1091_vm3, %v994_v34  ;;  %5634 = vmatprep.subr.msk.mxu1 %vm1091_vm3, %v2457_v37  ;;  %v2847_v38 = vld [vmem:[#allocation11 + $0x14] sm:$0xf]  ;;  %v960_v39 = vld [vmem:[#allocation11] sm:$0xf]  ;;  %p6494_p8 = pnand %p6493_p2, %p6487_p13 }
  0xdc   : > { %863 = vst.msk [vmem:[#allocation2 + $0xb0] sm:$0xff] %vm839_vm1, %v6575_v33  ;;  %865 = vst.msk [vmem:[#allocation2 + $0xc0] sm:$0xff] %vm839_vm1, %v6575_v33  ;;  %5635 = vmatpush3.msk.msra.mxu1 %vm1091_vm3, %v2457_v37  ;;  %5484 = vmatprep.subr.msk.mxu0 %vm1091_vm3, %v960_v39  ;;  %v7030_v40 = vld [vmem:[#allocation8] ss:$0 sm:$0xff]  ;;  %v7032_v42 = vld [vmem:[#allocation9] ss:$0 sm:$0xff] }
  0xdd   : > { %5396 = vmatmul.mubr.msk.f32.gmra.mrb[6].mxu0 %vm407_vm0, %v381_v8  ;;  %866 = vst.msk [vmem:[#allocation2 + $0xc8] sm:$0xff] %vm839_vm1, %v6575_v33  ;;  %868 = vst.msk [vmem:[#allocation2 + $0xd8] sm:$0xff] %vm839_vm1, %v6575_v33  ;;  %5684 = vmatprep.subr.msk.mxu1 %vm1091_vm3, %v2847_v38  ;;  %v7046_v62 = vld [vmem:[#allocation11 + $0x8] sm:$0xf] }
  0xde   : > { %5398 = vmatprep.mubr.msk.f32.mxu0 %vm407_vm0, %v382_v9  ;;  %869 = vst.msk [vmem:[#allocation2 + $0xe0] sm:$0xff] %vm839_vm1, %v6575_v33  ;;  %871 = vst.msk [vmem:[#allocation2 + $0xf0] sm:$0xff] %vm839_vm1, %v6575_v33 }
  0xdf   : > { %872 = vst.msk [vmem:[#allocation2 + $0xf8] sm:$0xff] %vm839_vm1, %v6575_v33  ;;  %874 = vst.msk [vmem:[#allocation2 + $0x108] sm:$0xff] %vm839_vm1, %v6575_v33 }
  0xe0   : > { %875 = vst.msk [vmem:[#allocation2 + $0x110] sm:$0xff] %vm839_vm1, %v6575_v33  ;;  %877 = vst.msk [vmem:[#allocation2 + $0x120] sm:$0xff] %vm839_vm1, %v6575_v33 }
  0xe1   : > { %5399 = vmatmul.mubr.msk.f32.gmra.mrb[8].mxu0 %vm407_vm0, %v383_v10  ;;  %878 = vst.msk [vmem:[#allocation2 + $0x128] sm:$0xff] %vm839_vm1, %v6575_v33  ;;  %880 = vst.msk [vmem:[#allocation2 + $0x138] sm:$0xff] %vm839_vm1, %v6575_v33 }
  0xe2   : > { %5401 = vmatprep.mubr.msk.f32.mxu0 %vm407_vm0, %v384_v11  ;;  %881 = vst.msk [vmem:[#allocation2 + $0x140] sm:$0xff] %vm839_vm1, %v6575_v33  ;;  %883 = vst.msk [vmem:[#allocation2 + $0x150] sm:$0xff] %vm839_vm1, %v6575_v33 }
  0xe3   : > { %884 = vst.msk [vmem:[#allocation2 + $0x158] sm:$0xff] %vm839_vm1, %v6575_v33  ;;  %886 = vst.msk [vmem:[#allocation2 + $0x168] sm:$0xff] %vm839_vm1, %v6575_v33 }
  0xe4   : > { %887 = vst.msk [vmem:[#allocation2 + $0x170] sm:$0xff] %vm839_vm1, %v6575_v33  ;;  %889 = vst.msk [vmem:[#allocation2 + $0x180] sm:$0xff] %vm839_vm1, %v6575_v33 }
  0xe5   : > { %5402 = vmatmul.mubr.msk.f32.gmra.mrb[10].mxu0 %vm407_vm0, %v385_v12  ;;  %890 = vst.msk [vmem:[#allocation2 + $0x188] sm:$0xff] %vm839_vm1, %v6575_v33  ;;  %892 = vst.msk [vmem:[#allocation2 + $0x198] sm:$0xff] %vm839_vm1, %v6575_v33  ;;  %v7062_v12 = vld [vmem:[#allocation11 + $0x18] sm:$0xf] }
  0xe6   : > { %5404 = vmatprep.mubr.msk.f32.mxu0 %vm407_vm0, %v386_v13  ;;  %893 = vst.msk [vmem:[#allocation2 + $0x1a0] sm:$0xff] %vm839_vm1, %v6575_v33 }
  0xe7   : > { %846 = vst.msk [vmem:[#allocation2 + $0x28] sm:$0x3] %vm842_vm2, %v6575_v33  ;;  %843 = vst.msk [vmem:[#allocation2 + $0x10] sm:$0x3] %vm842_vm2, %v6575_v33 }
  0xe8   : > { %849 = vst.msk [vmem:[#allocation2 + $0x40] sm:$0x3] %vm842_vm2, %v6575_v33  ;;  %852 = vst.msk [vmem:[#allocation2 + $0x58] sm:$0x3] %vm842_vm2, %v6575_v33 }
  0xe9   : > { %5405 = vmatmul.mubr.msk.f32.gmra.mrb[12].mxu0 %vm407_vm0, %v387_v14  ;;  %855 = vst.msk [vmem:[#allocation2 + $0x70] sm:$0x3] %vm842_vm2, %v6575_v33  ;;  %858 = vst.msk [vmem:[#allocation2 + $0x88] sm:$0x3] %vm842_vm2, %v6575_v33 }
  0xea   : > { %5407 = vmatprep.mubr.msk.f32.mxu0 %vm407_vm0, %v388_v15  ;;  %861 = vst.msk [vmem:[#allocation2 + $0xa0] sm:$0x3] %vm842_vm2, %v6575_v33  ;;  %864 = vst.msk [vmem:[#allocation2 + $0xb8] sm:$0x3] %vm842_vm2, %v6575_v33 }
  0xeb   : > { %867 = vst.msk [vmem:[#allocation2 + $0xd0] sm:$0x3] %vm842_vm2, %v6575_v33  ;;  %870 = vst.msk [vmem:[#allocation2 + $0xe8] sm:$0x3] %vm842_vm2, %v6575_v33 }
  0xec   : > { %873 = vst.msk [vmem:[#allocation2 + $0x100] sm:$0x3] %vm842_vm2, %v6575_v33  ;;  %876 = vst.msk [vmem:[#allocation2 + $0x118] sm:$0x3] %vm842_vm2, %v6575_v33 }
  0xed   : > { %5408 = vmatmul.mubr.msk.f32.gmra.mrb[14].mxu0 %vm407_vm0, %v389_v16  ;;  %879 = vst.msk [vmem:[#allocation2 + $0x130] sm:$0x3] %vm842_vm2, %v6575_v33  ;;  %882 = vst.msk [vmem:[#allocation2 + $0x148] sm:$0x3] %vm842_vm2, %v6575_v33 }
  0xee   : > { %5410 = vmatprep.mubr.msk.f32.mxu0 %vm407_vm0, %v390_v17  ;;  %885 = vst.msk [vmem:[#allocation2 + $0x160] sm:$0x3] %vm842_vm2, %v6575_v33  ;;  %888 = vst.msk [vmem:[#allocation2 + $0x178] sm:$0x3] %vm842_vm2, %v6575_v33  ;;  %v962_v36 = vld [vmem:[#allocation2 + $0x9] sm:$0xff] }
  0xef   : > { %891 = vst.msk [vmem:[#allocation2 + $0x190] sm:$0x3] %vm842_vm2, %v6575_v33  ;;  %894 = vst.msk [vmem:[#allocation2 + $0x1a8] sm:$0x3] %vm842_vm2, %v6575_v33 }
  0xf1   : > { %5411 = vmatmul.mubr.msk.f32.gmra.mrb[16].mxu0 %vm407_vm0, %v391_v18 }
  0xf2   : > { %5413 = vmatprep.mubr.msk.f32.mxu0 %vm407_vm0, %v392_v19 }
  0xf5   : > { %5414 = vmatmul.mubr.msk.f32.gmra.mrb[18].mxu0 %vm407_vm0, %v393_v20 }
  0xf6   : > { %5416 = vmatprep.mubr.msk.f32.mxu0 %vm407_vm0, %v394_v21 }
  0xf9   : > { %5417 = vmatmul.mubr.msk.f32.gmra.mrb[20].mxu0 %vm407_vm0, %v395_v22 }
  0xfa   : > { %5419 = vmatprep.mubr.msk.f32.mxu0 %vm407_vm0, %v396_v23 }
  0xfd   : > { %5420 = vmatmul.mubr.msk.f32.gmra.mrb[22].mxu0 %vm407_vm0, %v397_v24 }
  0xfe   : > { %5422 = vmatprep.mubr.msk.f32.mxu0 %vm407_vm0, %v398_v25 }
 0x101   : > { %5423 = vmatmul.mubr.msk.f32.gmra.mrb[24].mxu0 %vm407_vm0, %v399_v26 }
 0x102   : > { %5425 = vmatprep.mubr.msk.f32.mxu0 %vm407_vm0, %v400_v27 }
 0x105   : > { %5426 = vmatmul.mubr.msk.f32.gmra.mrb[26].mxu0 %vm407_vm0, %v401_v28 }
 0x106   : > { %5428 = vmatprep.mubr.msk.f32.mxu0 %vm407_vm0, %v402_v29 }
 0x109   : > { %5429 = vmatmul.mubr.msk.f32.gmra.mrb[28].mxu0 %vm407_vm0, %v403_v30 }
 0x10a   : > { %5431 = vmatprep.mubr.msk.f32.mxu0 %vm407_vm0, %v404_v31 }
 0x10d   : > { %5432 = vmatmul.mubr.msk.f32.gmra.mrb[30].mxu0 %vm407_vm0, %v405_v32 }
 0x10e   : > { %5436 = vmatprep.mubr.msk.f32.mxu0 %vm839_vm1, %v961_v35 }
 0x111   : > { %5437 = vmatmul.mubr.msk.f32.vlgmr.msra.gmra.mrb[32].mxu0 %vm839_vm1, %v962_v36 }
 0x112   : > { %5485 = vmatpush3.msk.msra.mxu0 %vm1091_vm3, %v960_v39 }
 0x113   : > { %5534 = vmatprep.subr.msk.mxu0 %vm1091_vm3, %v7046_v62 }
 0x1a4   : > { %v5388_v41 = vpop.f32.mrb[0].mxu0 }
 0x1a5   : > { %v737_v43 = vmul.f32 %v5388_v41, %v7030_v40  ;;  %v570_v44 = vpop.f32.mrb[1].mxu0 }
 0x1a6   : > { %v736_v45 = vmul.f32 %v7030_v40, %v570_v44 }
 0x1a7   : > { %v776_v46 = vadd.f32 %v7032_v42, %v737_v43 }
 0x1a8   : > { %v775_v47 = vadd.f32 %v7032_v42, %v736_v45  ;;  %v5391_v48 = vpop.f32.mrb[2].mxu0 }
 0x1a9   : > { %v808_v49 = vmax.f32 %v776_v46, 0.0  ;;  %v739_v50 = vmul.f32 %v5391_v48, %v7030_v40  ;;  %v580_v51 = vpop.f32.mrb[3].mxu0 }
 0x1aa   : > { %v807_v52 = vmax.f32 %v775_v47, 0.0  ;;  %v738_v53 = vmul.f32 %v7030_v40, %v580_v51 }
 0x1ab   : > { %897 = vst.msk [vmem:[#allocation2 + $0x21] sm:$0xff] %vm839_vm1, %v808_v49  ;;  %v778_v54 = vadd.f32 %v7032_v42, %v739_v50 }
 0x1ac   : > { %896 = vst.msk [vmem:[#allocation2 + $0x19] sm:$0xff] %vm839_vm1, %v807_v52  ;;  %v777_v55 = vadd.f32 %v7032_v42, %v738_v53  ;;  %v5394_v56 = vpop.f32.mrb[4].mxu0 }
 0x1ad   : > { %v810_v57 = vmax.f32 %v778_v54, 0.0  ;;  %v741_v58 = vmul.f32 %v5394_v56, %v7030_v40  ;;  %v590_v59 = vpop.f32.mrb[5].mxu0 }
 0x1ae   : > { %v809_v60 = vmax.f32 %v777_v55, 0.0  ;;  %v740_v61 = vmul.f32 %v7030_v40, %v590_v59 }
 0x1af   : > { %899 = vst.msk [vmem:[#allocation2 + $0x39] sm:$0xff] %vm839_vm1, %v810_v57  ;;  %v780_v63 = vadd.f32 %v7032_v42, %v741_v58 }
 0x1b0   : > { %898 = vst.msk [vmem:[#allocation2 + $0x31] sm:$0xff] %vm839_vm1, %v809_v60  ;;  %v779_v0 = vadd.f32 %v7032_v42, %v740_v61  ;;  %v5397_v1 = vpop.f32.mrb[6].mxu0 }
 0x1b1   : > { %v812_v2 = vmax.f32 %v780_v63, 0.0  ;;  %v743_v3 = vmul.f32 %v5397_v1, %v7030_v40  ;;  %v600_v4 = vpop.f32.mrb[7].mxu0 }
 0x1b2   : > { %v811_v5 = vmax.f32 %v779_v0, 0.0  ;;  %v742_v6 = vmul.f32 %v7030_v40, %v600_v4  ;;  %v964_v11 = vld [vmem:[#allocation2 + $0x21] sm:$0xff] }
 0x1b3   : > { %901 = vst.msk [vmem:[#allocation2 + $0x51] sm:$0xff] %vm839_vm1, %v812_v2  ;;  %v782_v7 = vadd.f32 %v7032_v42, %v743_v3  ;;  %v963_v8 = vld [vmem:[#allocation2 + $0x19] sm:$0xff] }
 0x1b4   : > { %900 = vst.msk [vmem:[#allocation2 + $0x49] sm:$0xff] %vm839_vm1, %v811_v5  ;;  %v781_v9 = vadd.f32 %v7032_v42, %v742_v6  ;;  %v5400_v10 = vpop.f32.mrb[8].mxu0  ;;  %5439 = vmatprep.mubr.msk.f32.mxu0 %vm839_vm1, %v963_v8  ;;  %5636 = vmatprep.mubr.msk.f32.mxu1 %vm839_vm1, %v963_v8 }
 0x1b5   : > { %v814_v13 = vmax.f32 %v782_v7, 0.0  ;;  %v745_v14 = vmul.f32 %v5400_v10, %v7030_v40  ;;  %v610_v15 = vpop.f32.mrb[9].mxu0  ;;  %5440 = vmatmul.mubr.msk.f32.gmra.mrb[34].mxu0 %vm839_vm1, %v964_v11  ;;  %5637 = vmatmul.mubr.msk.f32.vlgmr.msra.gmra.mrb[0].mxu1 %vm839_vm1, %v964_v11 }
 0x1b6   : > { %v813_v16 = vmax.f32 %v781_v9, 0.0  ;;  %v744_v17 = vmul.f32 %v7030_v40, %v610_v15  ;;  %5685 = vmatpush3.msk.msra.mxu1 %vm1091_vm3, %v2847_v38  ;;  %v7081_v22 = vld [vmem:[#allocation2 + $0x39] sm:$0xff] }
 0x1b7   : > { %903 = vst.msk [vmem:[#allocation2 + $0x69] sm:$0xff] %vm839_vm1, %v814_v13  ;;  %v784_v18 = vadd.f32 %v7032_v42, %v745_v14  ;;  %v7071_v19 = vld [vmem:[#allocation2 + $0x31] sm:$0xff]  ;;  %5734 = vmatprep.subr.msk.mxu1 %vm1091_vm3, %v7062_v12  ;;  %8267 = vst [vmem:[#allocation22_spill] sm:$0xff] %v7081_v22 }
 0x1b8   : > { %8266 = vst [vmem:[#allocation21_spill] sm:$0xff] %v7071_v19  ;;  %902 = vst.msk [vmem:[#allocation2 + $0x61] sm:$0xff] %vm839_vm1, %v813_v16  ;;  %v783_v20 = vadd.f32 %v7032_v42, %v744_v17  ;;  %v5403_v21 = vpop.f32.mrb[10].mxu0  ;;  %5442 = vmatprep.mubr.msk.f32.mxu0 %vm839_vm1, %v7071_v19  ;;  %5639 = vmatprep.mubr.msk.f32.mxu1 %vm839_vm1, %v7071_v19 }
 0x1b9   : > { %v816_v23 = vmax.f32 %v784_v18, 0.0  ;;  %v747_v24 = vmul.f32 %v5403_v21, %v7030_v40  ;;  %v620_v25 = vpop.f32.mrb[11].mxu0  ;;  %5443 = vmatmul.mubr.msk.f32.gmra.mrb[36].mxu0 %vm839_vm1, %v7081_v22  ;;  %5640 = vmatmul.mubr.msk.f32.gmra.mrb[2].mxu1 %vm839_vm1, %v7081_v22 }
 0x1ba   : > { %v815_v26 = vmax.f32 %v783_v20, 0.0  ;;  %v746_v27 = vmul.f32 %v7030_v40, %v620_v25  ;;  %v7099_v32 = vld [vmem:[#allocation2 + $0x51] sm:$0xff] }
 0x1bb   : > { %905 = vst.msk [vmem:[#allocation2 + $0x81] sm:$0xff] %vm839_vm1, %v816_v23  ;;  %v786_v28 = vadd.f32 %v7032_v42, %v747_v24  ;;  %v7091_v29 = vld [vmem:[#allocation2 + $0x49] sm:$0xff]  ;;  %8269 = vst [vmem:[#allocation24_spill] sm:$0xff] %v7099_v32 }
 0x1bc   : > { %8268 = vst [vmem:[#allocation23_spill] sm:$0xff] %v7091_v29  ;;  %904 = vst.msk [vmem:[#allocation2 + $0x79] sm:$0xff] %vm839_vm1, %v815_v26  ;;  %v785_v30 = vadd.f32 %v7032_v42, %v746_v27  ;;  %v5406_v31 = vpop.f32.mrb[12].mxu0  ;;  %5445 = vmatprep.mubr.msk.f32.mxu0 %vm839_vm1, %v7091_v29  ;;  %5642 = vmatprep.mubr.msk.f32.mxu1 %vm839_vm1, %v7091_v29 }
 0x1bd   : > { %v818_v33 = vmax.f32 %v786_v28, 0.0  ;;  %v749_v34 = vmul.f32 %v5406_v31, %v7030_v40  ;;  %v630_v35 = vpop.f32.mrb[13].mxu0  ;;  %5446 = vmatmul.mubr.msk.f32.gmra.mrb[38].mxu0 %vm839_vm1, %v7099_v32  ;;  %5643 = vmatmul.mubr.msk.f32.gmra.mrb[4].mxu1 %vm839_vm1, %v7099_v32  ;;  %v1644_v32 = vld [vmem:[#allocation2 + $0x2] sm:$0xff] }
 0x1be   : > { %v817_v36 = vmax.f32 %v785_v30, 0.0  ;;  %v748_v37 = vmul.f32 %v7030_v40, %v630_v35  ;;  %v7117_v44 = vld [vmem:[#allocation2 + $0x69] sm:$0xff] }
 0x1bf   : > { %907 = vst.msk [vmem:[#allocation2 + $0x99] sm:$0xff] %vm839_vm1, %v818_v33  ;;  %v788_v38 = vadd.f32 %v7032_v42, %v749_v34  ;;  %v7109_v39 = vld [vmem:[#allocation2 + $0x61] sm:$0xff]  ;;  %8271 = vst [vmem:[#allocation26_spill] sm:$0xff] %v7117_v44 }
 0x1c0   : > { %8270 = vst [vmem:[#allocation25_spill] sm:$0xff] %v7109_v39  ;;  %906 = vst.msk [vmem:[#allocation2 + $0x91] sm:$0xff] %vm839_vm1, %v817_v36  ;;  %v787_v41 = vadd.f32 %v7032_v42, %v748_v37  ;;  %v5409_v43 = vpop.f32.mrb[14].mxu0  ;;  %5448 = vmatprep.mubr.msk.f32.mxu0 %vm839_vm1, %v7109_v39  ;;  %5645 = vmatprep.mubr.msk.f32.mxu1 %vm839_vm1, %v7109_v39 }
 0x1c1   : > { %v820_v45 = vmax.f32 %v788_v38, 0.0  ;;  %v751_v46 = vmul.f32 %v5409_v43, %v7030_v40  ;;  %v640_v47 = vpop.f32.mrb[15].mxu0  ;;  %5449 = vmatmul.mubr.msk.f32.gmra.mrb[40].mxu0 %vm839_vm1, %v7117_v44  ;;  %5646 = vmatmul.mubr.msk.f32.gmra.mrb[6].mxu1 %vm839_vm1, %v7117_v44 }
 0x1c2   : > { %v819_v48 = vmax.f32 %v787_v41, 0.0  ;;  %v750_v49 = vmul.f32 %v7030_v40, %v640_v47  ;;  %v7135_v54 = vld [vmem:[#allocation2 + $0x81] sm:$0xff] }
 0x1c3   : > { %909 = vst.msk [vmem:[#allocation2 + $0xb1] sm:$0xff] %vm839_vm1, %v820_v45  ;;  %v790_v50 = vadd.f32 %v7032_v42, %v751_v46  ;;  %v7127_v51 = vld [vmem:[#allocation2 + $0x79] sm:$0xff]  ;;  %8273 = vst [vmem:[#allocation28_spill] sm:$0xff] %v7135_v54 }
 0x1c4   : > { %8272 = vst [vmem:[#allocation27_spill] sm:$0xff] %v7127_v51  ;;  %908 = vst.msk [vmem:[#allocation2 + $0xa9] sm:$0xff] %vm839_vm1, %v819_v48  ;;  %v789_v52 = vadd.f32 %v7032_v42, %v750_v49  ;;  %v5412_v53 = vpop.f32.mrb[16].mxu0  ;;  %5451 = vmatprep.mubr.msk.f32.mxu0 %vm839_vm1, %v7127_v51  ;;  %5648 = vmatprep.mubr.msk.f32.mxu1 %vm839_vm1, %v7127_v51 }
 0x1c5   : > { %v822_v55 = vmax.f32 %v790_v50, 0.0  ;;  %v753_v56 = vmul.f32 %v5412_v53, %v7030_v40  ;;  %v650_v57 = vpop.f32.mrb[17].mxu0  ;;  %5452 = vmatmul.mubr.msk.f32.gmra.mrb[42].mxu0 %vm839_vm1, %v7135_v54  ;;  %5649 = vmatmul.mubr.msk.f32.gmra.mrb[8].mxu1 %vm839_vm1, %v7135_v54 }
 0x1c6   : > { %v821_v58 = vmax.f32 %v789_v52, 0.0  ;;  %v752_v59 = vmul.f32 %v7030_v40, %v650_v57  ;;  %v7153_v1 = vld [vmem:[#allocation2 + $0x99] sm:$0xff] }
 0x1c7   : > { %911 = vst.msk [vmem:[#allocation2 + $0xc9] sm:$0xff] %vm839_vm1, %v822_v55  ;;  %v792_v60 = vadd.f32 %v7032_v42, %v753_v56  ;;  %v7145_v61 = vld [vmem:[#allocation2 + $0x91] sm:$0xff]  ;;  %8275 = vst [vmem:[#allocation30_spill] sm:$0xff] %v7153_v1 }
 0x1c8   : > { %8274 = vst [vmem:[#allocation29_spill] sm:$0xff] %v7145_v61  ;;  %910 = vst.msk [vmem:[#allocation2 + $0xc1] sm:$0xff] %vm839_vm1, %v821_v58  ;;  %v791_v63 = vadd.f32 %v7032_v42, %v752_v59  ;;  %v5415_v0 = vpop.f32.mrb[18].mxu0  ;;  %5454 = vmatprep.mubr.msk.f32.mxu0 %vm839_vm1, %v7145_v61  ;;  %5651 = vmatprep.mubr.msk.f32.mxu1 %vm839_vm1, %v7145_v61 }
 0x1c9   : > { %v824_v2 = vmax.f32 %v792_v60, 0.0  ;;  %v755_v3 = vmul.f32 %v5415_v0, %v7030_v40  ;;  %v660_v4 = vpop.f32.mrb[19].mxu0  ;;  %5455 = vmatmul.mubr.msk.f32.gmra.mrb[44].mxu0 %vm839_vm1, %v7153_v1  ;;  %5652 = vmatmul.mubr.msk.f32.gmra.mrb[10].mxu1 %vm839_vm1, %v7153_v1 }
 0x1ca   : > { %v823_v5 = vmax.f32 %v791_v63, 0.0  ;;  %v754_v6 = vmul.f32 %v7030_v40, %v660_v4  ;;  %v7171_v11 = vld [vmem:[#allocation2 + $0xb1] sm:$0xff] }
 0x1cb   : > { %913 = vst.msk [vmem:[#allocation2 + $0xe1] sm:$0xff] %vm839_vm1, %v824_v2  ;;  %v794_v7 = vadd.f32 %v7032_v42, %v755_v3  ;;  %v7163_v8 = vld [vmem:[#allocation2 + $0xa9] sm:$0xff]  ;;  %8277 = vst [vmem:[#allocation32_spill] sm:$0xff] %v7171_v11 }
 0x1cc   : > { %8276 = vst [vmem:[#allocation31_spill] sm:$0xff] %v7163_v8  ;;  %912 = vst.msk [vmem:[#allocation2 + $0xd9] sm:$0xff] %vm839_vm1, %v823_v5  ;;  %v793_v9 = vadd.f32 %v7032_v42, %v754_v6  ;;  %v5418_v10 = vpop.f32.mrb[20].mxu0  ;;  %5457 = vmatprep.mubr.msk.f32.mxu0 %vm839_vm1, %v7163_v8  ;;  %5654 = vmatprep.mubr.msk.f32.mxu1 %vm839_vm1, %v7163_v8 }
 0x1cd   : > { %v826_v13 = vmax.f32 %v794_v7, 0.0  ;;  %v757_v14 = vmul.f32 %v5418_v10, %v7030_v40  ;;  %v670_v15 = vpop.f32.mrb[21].mxu0  ;;  %5458 = vmatmul.mubr.msk.f32.gmra.mrb[46].mxu0 %vm839_vm1, %v7171_v11  ;;  %5655 = vmatmul.mubr.msk.f32.gmra.mrb[12].mxu1 %vm839_vm1, %v7171_v11 }
 0x1ce   : > { %v825_v16 = vmax.f32 %v793_v9, 0.0  ;;  %v756_v17 = vmul.f32 %v7030_v40, %v670_v15  ;;  %v7189_v24 = vld [vmem:[#allocation2 + $0xc9] sm:$0xff] }
 0x1cf   : > { %915 = vst.msk [vmem:[#allocation2 + $0xf9] sm:$0xff] %vm839_vm1, %v826_v13  ;;  %v796_v18 = vadd.f32 %v7032_v42, %v757_v14  ;;  %v7181_v20 = vld [vmem:[#allocation2 + $0xc1] sm:$0xff]  ;;  %8279 = vst [vmem:[#allocation34_spill] sm:$0xff] %v7189_v24 }
 0x1d0   : > { %8278 = vst [vmem:[#allocation33_spill] sm:$0xff] %v7181_v20  ;;  %914 = vst.msk [vmem:[#allocation2 + $0xf1] sm:$0xff] %vm839_vm1, %v825_v16  ;;  %v795_v21 = vadd.f32 %v7032_v42, %v756_v17  ;;  %v5421_v23 = vpop.f32.mrb[22].mxu0  ;;  %5460 = vmatprep.mubr.msk.f32.mxu0 %vm839_vm1, %v7181_v20  ;;  %5657 = vmatprep.mubr.msk.f32.mxu1 %vm839_vm1, %v7181_v20 }
 0x1d1   : > { %v828_v25 = vmax.f32 %v796_v18, 0.0  ;;  %v759_v26 = vmul.f32 %v5421_v23, %v7030_v40  ;;  %v680_v27 = vpop.f32.mrb[23].mxu0  ;;  %5461 = vmatmul.mubr.msk.f32.gmra.mrb[48].mxu0 %vm839_vm1, %v7189_v24  ;;  %5658 = vmatmul.mubr.msk.f32.gmra.mrb[14].mxu1 %vm839_vm1, %v7189_v24 }
 0x1d2   : > { %v827_v28 = vmax.f32 %v795_v21, 0.0  ;;  %v758_v30 = vmul.f32 %v7030_v40, %v680_v27  ;;  %v7207_v36 = vld [vmem:[#allocation2 + $0xe1] sm:$0xff] }
 0x1d3   : > { %917 = vst.msk [vmem:[#allocation2 + $0x111] sm:$0xff] %vm839_vm1, %v828_v25  ;;  %v798_v31 = vadd.f32 %v7032_v42, %v759_v26  ;;  %v7199_v33 = vld [vmem:[#allocation2 + $0xd9] sm:$0xff]  ;;  %8281 = vst [vmem:[#allocation36_spill] sm:$0xff] %v7207_v36 }
 0x1d4   : > { %8280 = vst [vmem:[#allocation35_spill] sm:$0xff] %v7199_v33  ;;  %916 = vst.msk [vmem:[#allocation2 + $0x109] sm:$0xff] %vm839_vm1, %v827_v28  ;;  %v797_v34 = vadd.f32 %v7032_v42, %v758_v30  ;;  %v5424_v35 = vpop.f32.mrb[24].mxu0  ;;  %5463 = vmatprep.mubr.msk.f32.mxu0 %vm839_vm1, %v7199_v33  ;;  %5660 = vmatprep.mubr.msk.f32.mxu1 %vm839_vm1, %v7199_v33 }
 0x1d5   : > { %v830_v37 = vmax.f32 %v798_v31, 0.0  ;;  %v761_v38 = vmul.f32 %v5424_v35, %v7030_v40  ;;  %v690_v41 = vpop.f32.mrb[25].mxu0  ;;  %5464 = vmatmul.mubr.msk.f32.gmra.mrb[50].mxu0 %vm839_vm1, %v7207_v36  ;;  %5661 = vmatmul.mubr.msk.f32.gmra.mrb[16].mxu1 %vm839_vm1, %v7207_v36 }
 0x1d6   : > { %v829_v43 = vmax.f32 %v797_v34, 0.0  ;;  %v760_v45 = vmul.f32 %v7030_v40, %v690_v41  ;;  %v7225_v50 = vld [vmem:[#allocation2 + $0xf9] sm:$0xff] }
 0x1d7   : > { %919 = vst.msk [vmem:[#allocation2 + $0x129] sm:$0xff] %vm839_vm1, %v830_v37  ;;  %v800_v46 = vadd.f32 %v7032_v42, %v761_v38  ;;  %v7217_v47 = vld [vmem:[#allocation2 + $0xf1] sm:$0xff]  ;;  %8283 = vst [vmem:[#allocation38_spill] sm:$0xff] %v7225_v50  ;;  %v928_v34 = vld [vmem:[#allocation2] sm:$0xff] }
 0x1d8   : > { %8282 = vst [vmem:[#allocation37_spill] sm:$0xff] %v7217_v47  ;;  %918 = vst.msk [vmem:[#allocation2 + $0x121] sm:$0xff] %vm839_vm1, %v829_v43  ;;  %v799_v48 = vadd.f32 %v7032_v42, %v760_v45  ;;  %v5427_v49 = vpop.f32.mrb[26].mxu0  ;;  %5466 = vmatprep.mubr.msk.f32.mxu0 %vm839_vm1, %v7217_v47  ;;  %5663 = vmatprep.mubr.msk.f32.mxu1 %vm839_vm1, %v7217_v47  ;;  %v929_v37 = vld [vmem:[#allocation2 + $0x8] sm:$0xff]  ;;  %v7321_v43 = vld [vmem:[#allocation2 + $0x18] sm:$0xff] }
 0x1d9   : > { %v832_v52 = vmax.f32 %v800_v46, 0.0  ;;  %v763_v53 = vmul.f32 %v5427_v49, %v7030_v40  ;;  %v700_v55 = vpop.f32.mrb[27].mxu0  ;;  %5467 = vmatmul.mubr.msk.f32.gmra.mrb[52].mxu0 %vm839_vm1, %v7225_v50  ;;  %5664 = vmatmul.mubr.msk.f32.gmra.mrb[18].mxu1 %vm839_vm1, %v7225_v50  ;;  %8296 = vst [vmem:[#allocation51_spill] sm:$0xff] %v7321_v43  ;;  %v7323_v45 = vld [vmem:[#allocation2 + $0x1a] sm:$0xff]  ;;  %v7325_v46 = vld [vmem:[#allocation11 + $0xc] sm:$0xf] }
 0x1da   : > { %v831_v56 = vmax.f32 %v799_v48, 0.0  ;;  %v762_v57 = vmul.f32 %v7030_v40, %v700_v55  ;;  %v7243_v0 = vld [vmem:[#allocation2 + $0x111] sm:$0xff]  ;;  %v7333_v48 = vld [vmem:[#allocation2 + $0x20] sm:$0xff] }
 0x1db   : > { %921 = vst.msk [vmem:[#allocation2 + $0x141] sm:$0xff] %vm839_vm1, %v832_v52  ;;  %v802_v58 = vadd.f32 %v7032_v42, %v763_v53  ;;  %v7235_v59 = vld [vmem:[#allocation2 + $0x109] sm:$0xff]  ;;  %8285 = vst [vmem:[#allocation40_spill] sm:$0xff] %v7243_v0  ;;  %v7337_v52 = vld [vmem:[#allocation11 + $0x1c] sm:$0xf] }
 0x1dc   : > { %8284 = vst [vmem:[#allocation39_spill] sm:$0xff] %v7235_v59  ;;  %920 = vst.msk [vmem:[#allocation2 + $0x139] sm:$0xff] %vm839_vm1, %v831_v56  ;;  %v801_v60 = vadd.f32 %v7032_v42, %v762_v57  ;;  %v5430_v63 = vpop.f32.mrb[28].mxu0  ;;  %5469 = vmatprep.mubr.msk.f32.mxu0 %vm839_vm1, %v7235_v59  ;;  %5666 = vmatprep.mubr.msk.f32.mxu1 %vm839_vm1, %v7235_v59  ;;  %v7335_v49 = vld [vmem:[#allocation2 + $0x22] sm:$0xff]  ;;  %v7345_v53 = vld [vmem:[#allocation2 + $0x30] sm:$0xff] }
 0x1dd   : > { %v834_v2 = vmax.f32 %v802_v58, 0.0  ;;  %v765_v3 = vmul.f32 %v5430_v63, %v7030_v40  ;;  %v710_v4 = vpop.f32.mrb[29].mxu0  ;;  %5470 = vmatmul.mubr.msk.f32.gmra.mrb[54].mxu0 %vm839_vm1, %v7243_v0  ;;  %5667 = vmatmul.mubr.msk.f32.gmra.mrb[20].mxu1 %vm839_vm1, %v7243_v0  ;;  %8297 = vst [vmem:[#allocation52_spill] sm:$0xff] %v7333_v48  ;;  %v7357_v55 = vld [vmem:[#allocation2 + $0x38] sm:$0xff]  ;;  %v7367_v57 = vld [vmem:[#allocation2 + $0x4a] sm:$0xff]  ;;  %v7381_v63 = vld [vmem:[#allocation2 + $0x60] sm:$0xff] }
 0x1de   : > { %v833_v5 = vmax.f32 %v801_v60, 0.0  ;;  %v764_v6 = vmul.f32 %v7030_v40, %v710_v4  ;;  %v7261_v14 = vld [vmem:[#allocation2 + $0x129] sm:$0xff]  ;;  %v7359_v56 = vld [vmem:[#allocation2 + $0x3a] sm:$0xff]  ;;  %v7375_v60 = vld [vmem:[#allocation2 + $0x52] sm:$0xff] }
 0x1df   : > { %923 = vst.msk [vmem:[#allocation2 + $0x159] sm:$0xff] %vm839_vm1, %v834_v2  ;;  %v804_v7 = vadd.f32 %v7032_v42, %v765_v3  ;;  %v7253_v9 = vld [vmem:[#allocation2 + $0x121] sm:$0xff]  ;;  %8287 = vst [vmem:[#allocation42_spill] sm:$0xff] %v7261_v14  ;;  %v7373_v58 = vld [vmem:[#allocation2 + $0x50] sm:$0xff] }
 0x1e0   : > { %8286 = vst [vmem:[#allocation41_spill] sm:$0xff] %v7253_v9  ;;  %922 = vst.msk [vmem:[#allocation2 + $0x151] sm:$0xff] %vm839_vm1, %v833_v5  ;;  %v803_v10 = vadd.f32 %v7032_v42, %v764_v6  ;;  %v5433_v13 = vpop.f32.mrb[30].mxu0  ;;  %5472 = vmatprep.mubr.msk.f32.mxu0 %vm839_vm1, %v7253_v9  ;;  %5669 = vmatprep.mubr.msk.f32.mxu1 %vm839_vm1, %v7253_v9  ;;  %v7383_v2 = vld [vmem:[#allocation2 + $0x62] sm:$0xff]  ;;  %v7391_v4 = vld [vmem:[#allocation2 + $0x6a] sm:$0xff] }
 0x1e1   : > { %v836_v15 = vmax.f32 %v804_v7, 0.0  ;;  %v767_v16 = vmul.f32 %v5433_v13, %v7030_v40  ;;  %v720_v17 = vpop.f32.mrb[31].mxu0  ;;  %5473 = vmatmul.mubr.msk.f32.gmra.mrb[56].mxu0 %vm839_vm1, %v7261_v14  ;;  %5670 = vmatmul.mubr.msk.f32.gmra.mrb[22].mxu1 %vm839_vm1, %v7261_v14  ;;  %v7389_v3 = vld [vmem:[#allocation2 + $0x68] sm:$0xff]  ;;  %v7397_v5 = vld [vmem:[#allocation2 + $0x78] sm:$0xff]  ;;  %v7405_v7 = vld [vmem:[#allocation2 + $0x80] sm:$0xff] }
 0x1e2   : > { %v835_v18 = vmax.f32 %v803_v10, 0.0  ;;  %v766_v21 = vmul.f32 %v7030_v40, %v720_v17  ;;  %v7279_v27 = vld [vmem:[#allocation2 + $0x141] sm:$0xff]  ;;  %v7413_v13 = vld [vmem:[#allocation2 + $0x90] sm:$0xff] }
 0x1e3   : > { %925 = vst.msk [vmem:[#allocation2 + $0x171] sm:$0xff] %vm839_vm1, %v836_v15  ;;  %v806_v23 = vadd.f32 %v7032_v42, %v767_v16  ;;  %v7271_v25 = vld [vmem:[#allocation2 + $0x139] sm:$0xff]  ;;  %8289 = vst [vmem:[#allocation44_spill] sm:$0xff] %v7279_v27  ;;  %v7407_v10 = vld [vmem:[#allocation2 + $0x82] sm:$0xff] }
 0x1e4   : > { %8288 = vst [vmem:[#allocation43_spill] sm:$0xff] %v7271_v25  ;;  %924 = vst.msk [vmem:[#allocation2 + $0x169] sm:$0xff] %vm839_vm1, %v835_v18  ;;  %v805_v26 = vadd.f32 %v7032_v42, %v766_v21  ;;  %5475 = vmatprep.mubr.msk.f32.mxu0 %vm839_vm1, %v7271_v25  ;;  %5672 = vmatprep.mubr.msk.f32.mxu1 %vm839_vm1, %v7271_v25  ;;  %v7399_v6 = vld [vmem:[#allocation2 + $0x7a] sm:$0xff]  ;;  %v7415_v15 = vld [vmem:[#allocation2 + $0x92] sm:$0xff] }
 0x1e5   : > { %v838_v28 = vmax.f32 %v806_v23, 0.0  ;;  %5476 = vmatmul.mubr.msk.f32.gmra.mrb[58].mxu0 %vm839_vm1, %v7279_v27  ;;  %5673 = vmatmul.mubr.msk.f32.gmra.mrb[24].mxu1 %vm839_vm1, %v7279_v27  ;;  %v7421_v16 = vld [vmem:[#allocation2 + $0x98] sm:$0xff]  ;;  %v7429_v18 = vld [vmem:[#allocation2 + $0xa8] sm:$0xff]  ;;  %v7437_v23 = vld [vmem:[#allocation2 + $0xb0] sm:$0xff] }
 0x1e6   : > { %v837_v40 = vmax.f32 %v805_v26, 0.0  ;;  %v7293_v42 = vld [vmem:[#allocation2 + $0x159] sm:$0xff]  ;;  %v7431_v21 = vld [vmem:[#allocation2 + $0xaa] sm:$0xff]  ;;  %v7511_v47 = vld [vmem:[#allocation2 + $0x122] sm:$0xff] }
 0x1e7   : > { %927 = vst.msk [vmem:[#allocation2 + $0x189] sm:$0xff] %vm839_vm1, %v838_v28  ;;  %v7286_v30 = vld [vmem:[#allocation2 + $0x151] sm:$0xff]  ;;  %8291 = vst [vmem:[#allocation46_spill] sm:$0xff] %v7293_v42  ;;  %v7423_v17 = vld [vmem:[#allocation2 + $0x9a] sm:$0xff] }
 0x1e8   : > { %8290 = vst [vmem:[#allocation45_spill] sm:$0xff] %v7286_v30  ;;  %926 = vst.msk [vmem:[#allocation2 + $0x181] sm:$0xff] %vm839_vm1, %v837_v40  ;;  %5478 = vmatprep.mubr.msk.f32.mxu0 %vm839_vm1, %v7286_v30  ;;  %5675 = vmatprep.mubr.msk.f32.mxu1 %vm839_vm1, %v7286_v30  ;;  %v7439_v26 = vld [vmem:[#allocation2 + $0xb2] sm:$0xff]  ;;  %v7445_v28 = vld [vmem:[#allocation2 + $0xc0] sm:$0xff] }
 0x1e9   : > { %5479 = vmatmul.mubr.msk.f32.gmra.mrb[60].mxu0 %vm839_vm1, %v7293_v42  ;;  %5676 = vmatmul.mubr.msk.f32.gmra.mrb[26].mxu1 %vm839_vm1, %v7293_v42  ;;  %v7447_v40 = vld [vmem:[#allocation2 + $0xc2] sm:$0xff]  ;;  %v7477_v42 = vld [vmem:[#allocation2 + $0xf0] sm:$0xff]  ;;  %v7485_v27 = vld [vmem:[#allocation2 + $0xf8] sm:$0xff] }
 0x1ea   : > { %v7305_v35 = vld [vmem:[#allocation2 + $0x171] sm:$0xff]  ;;  %v7487_v25 = vld [vmem:[#allocation2 + $0xfa] sm:$0xff]  ;;  %v7493_v14 = vld [vmem:[#allocation2 + $0x108] sm:$0xff] }
 0x1eb   : > { %v7299_v31 = vld [vmem:[#allocation2 + $0x169] sm:$0xff]  ;;  %8293 = vst [vmem:[#allocation48_spill] sm:$0xff] %v7305_v35  ;;  %v7479_v30 = vld [vmem:[#allocation2 + $0xf2] sm:$0xff]  ;;  %v7509_v50 = vld [vmem:[#allocation2 + $0x120] sm:$0xff] }
 0x1ec   : > { %8292 = vst [vmem:[#allocation47_spill] sm:$0xff] %v7299_v31  ;;  %5481 = vmatprep.mubr.msk.f32.mxu0 %vm839_vm1, %v7299_v31  ;;  %5678 = vmatprep.mubr.msk.f32.mxu1 %vm839_vm1, %v7299_v31  ;;  %v7471_v31 = vld [vmem:[#allocation2 + $0xe2] sm:$0xff]  ;;  %v7495_v9 = vld [vmem:[#allocation2 + $0x10a] sm:$0xff]  ;;  %v7503_v59 = vld [vmem:[#allocation2 + $0x112] sm:$0xff] }
 0x1ed   : > { %5482 = vmatmul.mubr.msk.f32.gmra.mrb[62].mxu0 %vm839_vm1, %v7305_v35  ;;  %5679 = vmatmul.mubr.msk.f32.gmra.mrb[28].mxu1 %vm839_vm1, %v7305_v35  ;;  %v7469_v35 = vld [vmem:[#allocation2 + $0xe0] sm:$0xff]  ;;  %v7501_v0 = vld [vmem:[#allocation2 + $0x110] sm:$0xff]  ;;  %v7517_v36 = vld [vmem:[#allocation2 + $0x128] sm:$0xff] }
 0x1ee   : > { %5486 = vmatprep.mubr.msk.f32.mxu0 %vm839_vm1, %v928_v34  ;;  %v7316_v41 = vld [vmem:[#allocation2 + $0x189] sm:$0xff]  ;;  %v7525_v24 = vld [vmem:[#allocation2 + $0x138] sm:$0xff]  ;;  %v7533_v11 = vld [vmem:[#allocation2 + $0x140] sm:$0xff] }
 0x1ef   : > { %v7312_v38 = vld [vmem:[#allocation2 + $0x181] sm:$0xff]  ;;  %8295 = vst [vmem:[#allocation50_spill] sm:$0xff] %v7316_v41  ;;  %v7519_v33 = vld [vmem:[#allocation2 + $0x12a] sm:$0xff]  ;;  %v7543_v61 = vld [vmem:[#allocation2 + $0x152] sm:$0xff] }
 0x1f0   : > { %8294 = vst [vmem:[#allocation49_spill] sm:$0xff] %v7312_v38  ;;  %5681 = vmatprep.mubr.msk.f32.mxu1 %vm839_vm1, %v7312_v38  ;;  %v7453_v34 = vld [vmem:[#allocation2 + $0xc8] sm:$0xff]  ;;  %v7463_v38 = vld [vmem:[#allocation2 + $0xda] sm:$0xff]  ;;  %v7541_v1 = vld [vmem:[#allocation2 + $0x150] sm:$0xff] }
 0x1f1   : > { %5487 = vmatmul.mubr.msk.f32.vlgmr.msra.gmra.mrb[32].mxu0 %vm839_vm1, %v929_v37  ;;  %5682 = vmatmul.mubr.msk.f32.gmra.mrb[30].mxu1 %vm839_vm1, %v7316_v41  ;;  %v7455_v37 = vld [vmem:[#allocation2 + $0xca] sm:$0xff]  ;;  %v7461_v41 = vld [vmem:[#allocation2 + $0xd8] sm:$0xff]  ;;  %v7535_v8 = vld [vmem:[#allocation2 + $0x142] sm:$0xff] }
 0x1f2   : > { %5489 = vmatprep.mubr.msk.f32.mxu0 %vm839_vm1, %v7321_v43  ;;  %5686 = vmatprep.mubr.msk.f32.mxu1 %vm839_vm1, %v7323_v45  ;;  %v7527_v20 = vld [vmem:[#allocation2 + $0x13a] sm:$0xff]  ;;  %v7557_v44 = vld [vmem:[#allocation2 + $0x168] sm:$0xff]  ;;  %v7565_v29 = vld [vmem:[#allocation2 + $0x170] sm:$0xff] }
 0x1f3   : > { %5535 = vmatpush3.msk.msra.mxu0 %vm1091_vm3, %v7046_v62  ;;  %v7351_v62 = vld [vmem:[#allocation2 + $0x32] sm:$0xff]  ;;  %v7551_v51 = vld [vmem:[#allocation2 + $0x15a] sm:$0xff]  ;;  %v7559_v39 = vld [vmem:[#allocation2 + $0x16a] sm:$0xff] }
 0x1f4   : > { %5584 = vmatprep.subr.msk.mxu0 %vm1091_vm3, %v7325_v46  ;;  %v7549_v54 = vld [vmem:[#allocation2 + $0x158] sm:$0xff]  ;;  %v7573_v19 = vld [vmem:[#allocation2 + $0x182] sm:$0xff]  ;;  %v7578_v43 = vld [vmem:[#allocation2 + $0x18a] sm:$0xff] }
 0x1f5   : > { %5490 = vmatmul.mubr.msk.f32.gmra.mrb[34].mxu0 %vm839_vm1, %v7333_v48  ;;  %5687 = vmatmul.mubr.msk.f32.vlgmr.msra.gmra.mrb[0].mxu1 %vm839_vm1, %v7335_v49  ;;  %v7567_v22 = vld [vmem:[#allocation2 + $0x172] sm:$0xff]  ;;  %8299 = vst [vmem:[#allocation54_spill] sm:$0xff] %v7573_v19  ;;  %v1645_v48 = vld [vmem:[#allocation2 + $0xa] sm:$0xff]  ;;  %8300 = vst [vmem:[#allocation55_spill] sm:$0xff] %v7578_v43 }
 0x1f6   : > { %5735 = vmatpush3.msk.msra.mxu1 %vm1091_vm3, %v7062_v12  ;;  %5492 = vmatprep.mubr.msk.f32.mxu0 %vm839_vm1, %v7345_v53  ;;  %v7365_v12 = vld [vmem:[#allocation2 + $0x48] sm:$0xff]  ;;  %8298 = vst [vmem:[#allocation53_spill] sm:$0xff] %v7567_v22 }
 0x1f7   : > { %5689 = vmatprep.mubr.msk.f32.mxu1 %vm839_vm1, %v7351_v62  ;;  %5784 = vmatprep.subr.msk.mxu1 %vm1091_vm3, %v7337_v52 }
 0x1f9   : > { %5493 = vmatmul.mubr.msk.f32.gmra.mrb[36].mxu0 %vm839_vm1, %v7357_v55  ;;  %5690 = vmatmul.mubr.msk.f32.gmra.mrb[2].mxu1 %vm839_vm1, %v7359_v56 }
 0x1fa   : > { %5495 = vmatprep.mubr.msk.f32.mxu0 %vm839_vm1, %v7365_v12  ;;  %5692 = vmatprep.mubr.msk.f32.mxu1 %vm839_vm1, %v7367_v57 }
 0x1fd   : > { %5496 = vmatmul.mubr.msk.f32.gmra.mrb[38].mxu0 %vm839_vm1, %v7373_v58  ;;  %5693 = vmatmul.mubr.msk.f32.gmra.mrb[4].mxu1 %vm839_vm1, %v7375_v60 }
 0x1fe   : > { %5498 = vmatprep.mubr.msk.f32.mxu0 %vm839_vm1, %v7381_v63  ;;  %5695 = vmatprep.mubr.msk.f32.mxu1 %vm839_vm1, %v7383_v2 }
 0x201   : > { %5499 = vmatmul.mubr.msk.f32.gmra.mrb[40].mxu0 %vm839_vm1, %v7389_v3  ;;  %5696 = vmatmul.mubr.msk.f32.gmra.mrb[6].mxu1 %vm839_vm1, %v7391_v4 }
 0x202   : > { %5501 = vmatprep.mubr.msk.f32.mxu0 %vm839_vm1, %v7397_v5  ;;  %5698 = vmatprep.mubr.msk.f32.mxu1 %vm839_vm1, %v7399_v6 }
 0x205   : > { %5502 = vmatmul.mubr.msk.f32.gmra.mrb[42].mxu0 %vm839_vm1, %v7405_v7  ;;  %5699 = vmatmul.mubr.msk.f32.gmra.mrb[8].mxu1 %vm839_vm1, %v7407_v10 }
 0x206   : > { %5504 = vmatprep.mubr.msk.f32.mxu0 %vm839_vm1, %v7413_v13  ;;  %5701 = vmatprep.mubr.msk.f32.mxu1 %vm839_vm1, %v7415_v15 }
 0x209   : > { %5505 = vmatmul.mubr.msk.f32.gmra.mrb[44].mxu0 %vm839_vm1, %v7421_v16  ;;  %5702 = vmatmul.mubr.msk.f32.gmra.mrb[10].mxu1 %vm839_vm1, %v7423_v17 }
 0x20a   : > { %5507 = vmatprep.mubr.msk.f32.mxu0 %vm839_vm1, %v7429_v18  ;;  %5704 = vmatprep.mubr.msk.f32.mxu1 %vm839_vm1, %v7431_v21 }
 0x20d   : > { %5508 = vmatmul.mubr.msk.f32.gmra.mrb[46].mxu0 %vm839_vm1, %v7437_v23  ;;  %5705 = vmatmul.mubr.msk.f32.gmra.mrb[12].mxu1 %vm839_vm1, %v7439_v26 }
 0x20e   : > { %5510 = vmatprep.mubr.msk.f32.mxu0 %vm839_vm1, %v7445_v28  ;;  %5707 = vmatprep.mubr.msk.f32.mxu1 %vm839_vm1, %v7447_v40 }
 0x211   : > { %5511 = vmatmul.mubr.msk.f32.gmra.mrb[48].mxu0 %vm839_vm1, %v7453_v34  ;;  %5708 = vmatmul.mubr.msk.f32.gmra.mrb[14].mxu1 %vm839_vm1, %v7455_v37 }
 0x212   : > { %5513 = vmatprep.mubr.msk.f32.mxu0 %vm839_vm1, %v7461_v41  ;;  %5710 = vmatprep.mubr.msk.f32.mxu1 %vm839_vm1, %v7463_v38 }
 0x215   : > { %5514 = vmatmul.mubr.msk.f32.gmra.mrb[50].mxu0 %vm839_vm1, %v7469_v35  ;;  %5711 = vmatmul.mubr.msk.f32.gmra.mrb[16].mxu1 %vm839_vm1, %v7471_v31 }
 0x216   : > { %5516 = vmatprep.mubr.msk.f32.mxu0 %vm839_vm1, %v7477_v42  ;;  %5713 = vmatprep.mubr.msk.f32.mxu1 %vm839_vm1, %v7479_v30 }
 0x219   : > { %5517 = vmatmul.mubr.msk.f32.gmra.mrb[52].mxu0 %vm839_vm1, %v7485_v27  ;;  %5714 = vmatmul.mubr.msk.f32.gmra.mrb[18].mxu1 %vm839_vm1, %v7487_v25 }
 0x21a   : > { %5519 = vmatprep.mubr.msk.f32.mxu0 %vm839_vm1, %v7493_v14  ;;  %5716 = vmatprep.mubr.msk.f32.mxu1 %vm839_vm1, %v7495_v9 }
 0x21d   : > { %5520 = vmatmul.mubr.msk.f32.gmra.mrb[54].mxu0 %vm839_vm1, %v7501_v0  ;;  %5717 = vmatmul.mubr.msk.f32.gmra.mrb[20].mxu1 %vm839_vm1, %v7503_v59 }
 0x21e   : > { %5522 = vmatprep.mubr.msk.f32.mxu0 %vm839_vm1, %v7509_v50  ;;  %5719 = vmatprep.mubr.msk.f32.mxu1 %vm839_vm1, %v7511_v47 }
 0x221   : > { %5523 = vmatmul.mubr.msk.f32.gmra.mrb[56].mxu0 %vm839_vm1, %v7517_v36  ;;  %5720 = vmatmul.mubr.msk.f32.gmra.mrb[22].mxu1 %vm839_vm1, %v7519_v33 }
 0x222   : > { %5525 = vmatprep.mubr.msk.f32.mxu0 %vm839_vm1, %v7525_v24  ;;  %5722 = vmatprep.mubr.msk.f32.mxu1 %vm839_vm1, %v7527_v20 }
 0x225   : > { %5526 = vmatmul.mubr.msk.f32.gmra.mrb[58].mxu0 %vm839_vm1, %v7533_v11  ;;  %5723 = vmatmul.mubr.msk.f32.gmra.mrb[24].mxu1 %vm839_vm1, %v7535_v8 }
 0x226   : > { %5528 = vmatprep.mubr.msk.f32.mxu0 %vm839_vm1, %v7541_v1  ;;  %5725 = vmatprep.mubr.msk.f32.mxu1 %vm839_vm1, %v7543_v61 }
 0x229   : > { %5529 = vmatmul.mubr.msk.f32.gmra.mrb[60].mxu0 %vm839_vm1, %v7549_v54  ;;  %5726 = vmatmul.mubr.msk.f32.gmra.mrb[26].mxu1 %vm839_vm1, %v7551_v51 }
 0x22a   : > { %5531 = vmatprep.mubr.msk.f32.mxu0 %vm839_vm1, %v7557_v44  ;;  %5728 = vmatprep.mubr.msk.f32.mxu1 %vm839_vm1, %v7559_v39 }
 0x22d   : > { %5532 = vmatmul.mubr.msk.f32.gmra.mrb[62].mxu0 %vm839_vm1, %v7565_v29  ;;  %5729 = vmatmul.mubr.msk.f32.gmra.mrb[28].mxu1 %vm839_vm1, %v7567_v22 }
 0x22e   : > { %5731 = vmatprep.mubr.msk.f32.mxu1 %vm839_vm1, %v7573_v19  ;;  %5536 = vmatprep.mubr.msk.f32.mxu0 %vm839_vm1, %v1644_v32  ;;  %v7589_v19 = vld [vmem:[#allocation11 + $0x20] sm:$0xf]  ;;  %v7703_v32 = vld [vmem:[#allocation2 + $0x180] sm:$0xff] }
 0x231   : > { %5537 = vmatmul.mubr.msk.f32.vlgmr.msra.gmra.mrb[32].mxu0 %vm839_vm1, %v1645_v48  ;;  %5732 = vmatmul.mubr.msk.f32.gmra.mrb[30].mxu1 %vm839_vm1, %v7578_v43  ;;  %v8301_v48 = vld [vmem:[#allocation51_spill] sm:$0xff]  ;;  %v8303_v43 = vld [vmem:[#allocation21_spill] sm:$0xff] }
 0x232   : > { %5539 = vmatprep.mubr.msk.f32.mxu0 %vm839_vm1, %v7323_v45  ;;  %5736 = vmatprep.mubr.msk.f32.mxu1 %vm839_vm1, %v7345_v53  ;;  %v3235_v45 = vld [vmem:[#allocation2 + $0x198] sm:$0xff] }
 0x233   : > { %5585 = vmatpush3.msk.msra.mxu0 %vm1091_vm3, %v7325_v46  ;;  %v7709_v46 = vld [vmem:[#allocation2 + $0x188] sm:$0xff] }
 0x235   : > { %5540 = vmatmul.mubr.msk.f32.gmra.mrb[34].mxu0 %vm839_vm1, %v7335_v49  ;;  %5737 = vmatmul.mubr.msk.f32.vlgmr.msra.gmra.mrb[0].mxu1 %vm839_vm1, %v7357_v55  ;;  %v3236_v49 = vld [vmem:[#allocation2 + $0x1a0] sm:$0xff] }
 0x236   : > { %5785 = vmatpush3.msk.msra.mxu1 %vm1091_vm3, %v7337_v52  ;;  %5542 = vmatprep.mubr.msk.f32.mxu0 %vm839_vm1, %v7351_v62  ;;  %v8302_v52 = vld [vmem:[#allocation52_spill] sm:$0xff] }
 0x237   : > { %5739 = vmatprep.mubr.msk.f32.mxu1 %vm839_vm1, %v7365_v12  ;;  %5834 = vmatprep.subr.msk.mxu1 %vm1091_vm3, %v7589_v19 }
 0x239   : > { %5543 = vmatmul.mubr.msk.f32.gmra.mrb[36].mxu0 %vm839_vm1, %v7359_v56  ;;  %5740 = vmatmul.mubr.msk.f32.gmra.mrb[2].mxu1 %vm839_vm1, %v7373_v58 }
 0x23a   : > { %5545 = vmatprep.mubr.msk.f32.mxu0 %vm839_vm1, %v7367_v57  ;;  %5742 = vmatprep.mubr.msk.f32.mxu1 %vm839_vm1, %v7381_v63 }
 0x23d   : > { %5546 = vmatmul.mubr.msk.f32.gmra.mrb[38].mxu0 %vm839_vm1, %v7375_v60  ;;  %5743 = vmatmul.mubr.msk.f32.gmra.mrb[4].mxu1 %vm839_vm1, %v7389_v3 }
 0x23e   : > { %5548 = vmatprep.mubr.msk.f32.mxu0 %vm839_vm1, %v7383_v2  ;;  %5745 = vmatprep.mubr.msk.f32.mxu1 %vm839_vm1, %v7397_v5 }
 0x241   : > { %5549 = vmatmul.mubr.msk.f32.gmra.mrb[40].mxu0 %vm839_vm1, %v7391_v4  ;;  %5746 = vmatmul.mubr.msk.f32.gmra.mrb[6].mxu1 %vm839_vm1, %v7405_v7 }
 0x242   : > { %5551 = vmatprep.mubr.msk.f32.mxu0 %vm839_vm1, %v7399_v6  ;;  %5748 = vmatprep.mubr.msk.f32.mxu1 %vm839_vm1, %v7413_v13 }
 0x245   : > { %5552 = vmatmul.mubr.msk.f32.gmra.mrb[42].mxu0 %vm839_vm1, %v7407_v10  ;;  %5749 = vmatmul.mubr.msk.f32.gmra.mrb[8].mxu1 %vm839_vm1, %v7421_v16 }
 0x246   : > { %5554 = vmatprep.mubr.msk.f32.mxu0 %vm839_vm1, %v7415_v15  ;;  %5751 = vmatprep.mubr.msk.f32.mxu1 %vm839_vm1, %v7429_v18 }
 0x249   : > { %5555 = vmatmul.mubr.msk.f32.gmra.mrb[44].mxu0 %vm839_vm1, %v7423_v17  ;;  %5752 = vmatmul.mubr.msk.f32.gmra.mrb[10].mxu1 %vm839_vm1, %v7437_v23 }
 0x24a   : > { %5557 = vmatprep.mubr.msk.f32.mxu0 %vm839_vm1, %v7431_v21  ;;  %5754 = vmatprep.mubr.msk.f32.mxu1 %vm839_vm1, %v7445_v28 }
 0x24d   : > { %5558 = vmatmul.mubr.msk.f32.gmra.mrb[46].mxu0 %vm839_vm1, %v7439_v26  ;;  %5755 = vmatmul.mubr.msk.f32.gmra.mrb[12].mxu1 %vm839_vm1, %v7453_v34 }
 0x24e   : > { %5560 = vmatprep.mubr.msk.f32.mxu0 %vm839_vm1, %v7447_v40  ;;  %5757 = vmatprep.mubr.msk.f32.mxu1 %vm839_vm1, %v7461_v41 }
 0x251   : > { %5561 = vmatmul.mubr.msk.f32.gmra.mrb[48].mxu0 %vm839_vm1, %v7455_v37  ;;  %5758 = vmatmul.mubr.msk.f32.gmra.mrb[14].mxu1 %vm839_vm1, %v7469_v35 }
 0x252   : > { %5563 = vmatprep.mubr.msk.f32.mxu0 %vm839_vm1, %v7463_v38  ;;  %5760 = vmatprep.mubr.msk.f32.mxu1 %vm839_vm1, %v7477_v42 }
 0x255   : > { %5564 = vmatmul.mubr.msk.f32.gmra.mrb[50].mxu0 %vm839_vm1, %v7471_v31  ;;  %5761 = vmatmul.mubr.msk.f32.gmra.mrb[16].mxu1 %vm839_vm1, %v7485_v27 }
 0x256   : > { %5566 = vmatprep.mubr.msk.f32.mxu0 %vm839_vm1, %v7479_v30  ;;  %5763 = vmatprep.mubr.msk.f32.mxu1 %vm839_vm1, %v7493_v14 }
 0x259   : > { %5567 = vmatmul.mubr.msk.f32.gmra.mrb[52].mxu0 %vm839_vm1, %v7487_v25  ;;  %5764 = vmatmul.mubr.msk.f32.gmra.mrb[18].mxu1 %vm839_vm1, %v7501_v0 }
 0x25a   : > { %5569 = vmatprep.mubr.msk.f32.mxu0 %vm839_vm1, %v7495_v9  ;;  %5766 = vmatprep.mubr.msk.f32.mxu1 %vm839_vm1, %v7509_v50 }
 0x25d   : > { %5570 = vmatmul.mubr.msk.f32.gmra.mrb[54].mxu0 %vm839_vm1, %v7503_v59  ;;  %5767 = vmatmul.mubr.msk.f32.gmra.mrb[20].mxu1 %vm839_vm1, %v7517_v36 }
 0x25e   : > { %5572 = vmatprep.mubr.msk.f32.mxu0 %vm839_vm1, %v7511_v47  ;;  %5769 = vmatprep.mubr.msk.f32.mxu1 %vm839_vm1, %v7525_v24 }
 0x261   : > { %5573 = vmatmul.mubr.msk.f32.gmra.mrb[56].mxu0 %vm839_vm1, %v7519_v33  ;;  %5770 = vmatmul.mubr.msk.f32.gmra.mrb[22].mxu1 %vm839_vm1, %v7533_v11 }
 0x262   : > { %5575 = vmatprep.mubr.msk.f32.mxu0 %vm839_vm1, %v7527_v20  ;;  %5772 = vmatprep.mubr.msk.f32.mxu1 %vm839_vm1, %v7541_v1 }
 0x265   : > { %5576 = vmatmul.mubr.msk.f32.gmra.mrb[58].mxu0 %vm839_vm1, %v7535_v8  ;;  %5773 = vmatmul.mubr.msk.f32.gmra.mrb[24].mxu1 %vm839_vm1, %v7549_v54 }
 0x266   : > { %5578 = vmatprep.mubr.msk.f32.mxu0 %vm839_vm1, %v7543_v61  ;;  %5775 = vmatprep.mubr.msk.f32.mxu1 %vm839_vm1, %v7557_v44 }
 0x269   : > { %5579 = vmatmul.mubr.msk.f32.gmra.mrb[60].mxu0 %vm839_vm1, %v7551_v51  ;;  %5776 = vmatmul.mubr.msk.f32.gmra.mrb[26].mxu1 %vm839_vm1, %v7565_v29 }
 0x26a   : > { %5581 = vmatprep.mubr.msk.f32.mxu0 %vm839_vm1, %v7559_v39  ;;  %5778 = vmatprep.mubr.msk.f32.mxu1 %vm839_vm1, %v7703_v32 }
 0x26d   : > { %5582 = vmatmul.mubr.msk.f32.gmra.mrb[62].mxu0 %vm839_vm1, %v7567_v22  ;;  %5779 = vmatmul.mubr.msk.f32.gmra.mrb[28].mxu1 %vm839_vm1, %v7709_v46  ;;  %v8304_v22 = vld [vmem:[#allocation22_spill] sm:$0xff] }
 0x26e   : > { %5586 = vmatprep.mubr.msk.f32.mxu0 %vm839_vm1, %v8301_v48  ;;  %5781 = vmatprep.mubr.msk.f32.mxu1 %vm839_vm1, %v3235_v45  ;;  %v8305_v45 = vld [vmem:[#allocation23_spill] sm:$0xff] }
 0x271   : > { %5587 = vmatmul.mubr.msk.f32.vlgmr.msra.gmra.mrb[32].mxu0 %vm839_vm1, %v8302_v52  ;;  %5782 = vmatmul.mubr.msk.f32.gmra.mrb[30].mxu1 %vm839_vm1, %v3236_v49 }
 0x272   : > { %5589 = vmatprep.mubr.msk.f32.mxu0 %vm839_vm1, %v7345_v53  ;;  %5786 = vmatprep.mubr.msk.f32.mxu1 %vm839_vm1, %v8303_v43  ;;  %v8306_v53 = vld [vmem:[#allocation24_spill] sm:$0xff]  ;;  %v8307_v43 = vld [vmem:[#allocation25_spill] sm:$0xff] }
 0x275   : > { %5590 = vmatmul.mubr.msk.f32.gmra.mrb[34].mxu0 %vm839_vm1, %v7357_v55  ;;  %5787 = vmatmul.mubr.msk.f32.vlgmr.msra.gmra.mrb[0].mxu1 %vm839_vm1, %v8304_v22  ;;  %v8309_v22 = vld [vmem:[#allocation27_spill] sm:$0xff]  ;;  %v8310_v55 = vld [vmem:[#allocation28_spill] sm:$0xff] }
 0x276   : > { %5835 = vmatpush3.msk.msra.mxu1 %vm1091_vm3, %v7589_v19  ;;  %5592 = vmatprep.mubr.msk.f32.mxu0 %vm839_vm1, %v7365_v12  ;;  %v8308_v19 = vld [vmem:[#allocation26_spill] sm:$0xff]  ;;  %v8311_v12 = vld [vmem:[#allocation29_spill] sm:$0xff] }
 0x277   : > { %5789 = vmatprep.mubr.msk.f32.mxu1 %vm839_vm1, %v8305_v45 }
 0x279   : > { %5593 = vmatmul.mubr.msk.f32.gmra.mrb[36].mxu0 %vm839_vm1, %v7373_v58  ;;  %5790 = vmatmul.mubr.msk.f32.gmra.mrb[2].mxu1 %vm839_vm1, %v8306_v53  ;;  %v8312_v58 = vld [vmem:[#allocation30_spill] sm:$0xff] }
 0x27a   : > { %5595 = vmatprep.mubr.msk.f32.mxu0 %vm839_vm1, %v7381_v63  ;;  %5792 = vmatprep.mubr.msk.f32.mxu1 %vm839_vm1, %v8307_v43  ;;  %v8313_v63 = vld [vmem:[#allocation31_spill] sm:$0xff] }
 0x27d   : > { %5596 = vmatmul.mubr.msk.f32.gmra.mrb[38].mxu0 %vm839_vm1, %v7389_v3  ;;  %5793 = vmatmul.mubr.msk.f32.gmra.mrb[4].mxu1 %vm839_vm1, %v8308_v19  ;;  %v8314_v3 = vld [vmem:[#allocation32_spill] sm:$0xff] }
 0x27e   : > { %5598 = vmatprep.mubr.msk.f32.mxu0 %vm839_vm1, %v7397_v5  ;;  %5795 = vmatprep.mubr.msk.f32.mxu1 %vm839_vm1, %v8309_v22  ;;  %v8315_v5 = vld [vmem:[#allocation33_spill] sm:$0xff]  ;;  %v7959_v22 = vld [vmem:[#allocation12] ss:$0 sm:$0xff] }
 0x281   : > { %5599 = vmatmul.mubr.msk.f32.gmra.mrb[40].mxu0 %vm839_vm1, %v7405_v7  ;;  %5796 = vmatmul.mubr.msk.f32.gmra.mrb[6].mxu1 %vm839_vm1, %v8310_v55  ;;  %v8316_v7 = vld [vmem:[#allocation34_spill] sm:$0xff] }
 0x282   : > { %5601 = vmatprep.mubr.msk.f32.mxu0 %vm839_vm1, %v7413_v13  ;;  %5798 = vmatprep.mubr.msk.f32.mxu1 %vm839_vm1, %v8311_v12  ;;  %v8317_v13 = vld [vmem:[#allocation35_spill] sm:$0xff] }
 0x285   : > { %5602 = vmatmul.mubr.msk.f32.gmra.mrb[42].mxu0 %vm839_vm1, %v7421_v16  ;;  %5799 = vmatmul.mubr.msk.f32.gmra.mrb[8].mxu1 %vm839_vm1, %v8312_v58  ;;  %v8318_v16 = vld [vmem:[#allocation36_spill] sm:$0xff] }
 0x286   : > { %5604 = vmatprep.mubr.msk.f32.mxu0 %vm839_vm1, %v7429_v18  ;;  %5801 = vmatprep.mubr.msk.f32.mxu1 %vm839_vm1, %v8313_v63  ;;  %v8319_v18 = vld [vmem:[#allocation37_spill] sm:$0xff]  ;;  %v7961_v58 = vld [vmem:[#allocation14] ss:$0 sm:$0xff] }
 0x289   : > { %5605 = vmatmul.mubr.msk.f32.gmra.mrb[44].mxu0 %vm839_vm1, %v7437_v23  ;;  %5802 = vmatmul.mubr.msk.f32.gmra.mrb[10].mxu1 %vm839_vm1, %v8314_v3  ;;  %v8320_v23 = vld [vmem:[#allocation38_spill] sm:$0xff] }
 0x28a   : > { %5607 = vmatprep.mubr.msk.f32.mxu0 %vm839_vm1, %v7445_v28  ;;  %5804 = vmatprep.mubr.msk.f32.mxu1 %vm839_vm1, %v8315_v5  ;;  %v3626_v28 = vld [vmem:[#allocation2 + $0x1a1] sm:$0xff] }
 0x28d   : > { %5608 = vmatmul.mubr.msk.f32.gmra.mrb[46].mxu0 %vm839_vm1, %v7453_v34  ;;  %5805 = vmatmul.mubr.msk.f32.gmra.mrb[12].mxu1 %vm839_vm1, %v8316_v7 }
 0x28e   : > { %5610 = vmatprep.mubr.msk.f32.mxu0 %vm839_vm1, %v7461_v41  ;;  %5807 = vmatprep.mubr.msk.f32.mxu1 %vm839_vm1, %v8317_v13  ;;  %v8321_v41 = vld [vmem:[#allocation39_spill] sm:$0xff] }
 0x291   : > { %5611 = vmatmul.mubr.msk.f32.gmra.mrb[48].mxu0 %vm839_vm1, %v7469_v35  ;;  %5808 = vmatmul.mubr.msk.f32.gmra.mrb[14].mxu1 %vm839_vm1, %v8318_v16  ;;  %v8322_v35 = vld [vmem:[#allocation40_spill] sm:$0xff] }
 0x292   : > { %5613 = vmatprep.mubr.msk.f32.mxu0 %vm839_vm1, %v7477_v42  ;;  %5810 = vmatprep.mubr.msk.f32.mxu1 %vm839_vm1, %v8319_v18  ;;  %v8323_v42 = vld [vmem:[#allocation41_spill] sm:$0xff] }
 0x295   : > { %5614 = vmatmul.mubr.msk.f32.gmra.mrb[50].mxu0 %vm839_vm1, %v7485_v27  ;;  %5811 = vmatmul.mubr.msk.f32.gmra.mrb[16].mxu1 %vm839_vm1, %v8320_v23  ;;  %v8324_v27 = vld [vmem:[#allocation42_spill] sm:$0xff] }
 0x296   : > { %5616 = vmatprep.mubr.msk.f32.mxu0 %vm839_vm1, %v7493_v14  ;;  %5813 = vmatprep.mubr.msk.f32.mxu1 %vm839_vm1, %v8321_v41  ;;  %v8325_v14 = vld [vmem:[#allocation43_spill] sm:$0xff] }
 0x299   : > { %5617 = vmatmul.mubr.msk.f32.gmra.mrb[52].mxu0 %vm839_vm1, %v7501_v0  ;;  %5814 = vmatmul.mubr.msk.f32.gmra.mrb[18].mxu1 %vm839_vm1, %v8322_v35  ;;  %v8326_v0 = vld [vmem:[#allocation44_spill] sm:$0xff] }
 0x29a   : > { %5619 = vmatprep.mubr.msk.f32.mxu0 %vm839_vm1, %v7509_v50  ;;  %5816 = vmatprep.mubr.msk.f32.mxu1 %vm839_vm1, %v8323_v42  ;;  %v8327_v50 = vld [vmem:[#allocation45_spill] sm:$0xff]  ;;  %v6254_v35 = vld [vmem:[%s6885_s15 + $0x8] sm:$0xff] }
 0x29d   : > { %5620 = vmatmul.mubr.msk.f32.gmra.mrb[54].mxu0 %vm839_vm1, %v7517_v36  ;;  %5817 = vmatmul.mubr.msk.f32.gmra.mrb[20].mxu1 %vm839_vm1, %v8324_v27  ;;  %v8328_v36 = vld [vmem:[#allocation46_spill] sm:$0xff] }
 0x29e   : > { %5622 = vmatprep.mubr.msk.f32.mxu0 %vm839_vm1, %v7525_v24  ;;  %5819 = vmatprep.mubr.msk.f32.mxu1 %vm839_vm1, %v8325_v14  ;;  %v8329_v24 = vld [vmem:[#allocation47_spill] sm:$0xff] }
 0x29f   : > { %v6255_v14 = vld [vmem:[%s6885_s15] sm:$0xff] }
 0x2a1   : > { %5623 = vmatmul.mubr.msk.f32.gmra.mrb[56].mxu0 %vm839_vm1, %v7533_v11  ;;  %5820 = vmatmul.mubr.msk.f32.gmra.mrb[22].mxu1 %vm839_vm1, %v8326_v0  ;;  %v8330_v11 = vld [vmem:[#allocation48_spill] sm:$0xff] }
 0x2a2   : > { %5625 = vmatprep.mubr.msk.f32.mxu0 %vm839_vm1, %v7541_v1  ;;  %5822 = vmatprep.mubr.msk.f32.mxu1 %vm839_vm1, %v8327_v50  ;;  %v8331_v1 = vld [vmem:[#allocation49_spill] sm:$0xff] }
 0x2a5   : > { %5626 = vmatmul.mubr.msk.f32.gmra.mrb[58].mxu0 %vm839_vm1, %v7549_v54  ;;  %5823 = vmatmul.mubr.msk.f32.gmra.mrb[24].mxu1 %vm839_vm1, %v8328_v36  ;;  %v3625_v54 = vld [vmem:[#allocation2 + $0x199] sm:$0xff] }
 0x2a6   : > { %5628 = vmatprep.mubr.msk.f32.mxu0 %vm839_vm1, %v7557_v44  ;;  %5825 = vmatprep.mubr.msk.f32.mxu1 %vm839_vm1, %v8329_v24  ;;  %v8332_v44 = vld [vmem:[#allocation50_spill] sm:$0xff] }
 0x2a9   : > { %5629 = vmatmul.mubr.msk.f32.gmra.mrb[60].mxu0 %vm839_vm1, %v7565_v29  ;;  %5826 = vmatmul.mubr.msk.f32.gmra.mrb[26].mxu1 %vm839_vm1, %v8330_v11  ;;  %v8333_v29 = vld [vmem:[#allocation53_spill] sm:$0xff] }
 0x2aa   : > { %5631 = vmatprep.mubr.msk.f32.mxu0 %vm839_vm1, %v7703_v32  ;;  %5828 = vmatprep.mubr.msk.f32.mxu1 %vm839_vm1, %v8331_v1 }
 0x2ad   : > { %5632 = vmatmul.mubr.msk.f32.gmra.mrb[62].mxu0 %vm839_vm1, %v7709_v46  ;;  %5829 = vmatmul.mubr.msk.f32.gmra.mrb[28].mxu1 %vm839_vm1, %v8332_v44 }
 0x2ae   : > { %5831 = vmatprep.mubr.msk.f32.mxu1 %vm839_vm1, %v3625_v54 }
 0x2b1   : > { %5832 = vmatmul.mubr.msk.f32.gmra.mrb[30].mxu1 %vm839_vm1, %v3626_v28 }
 0x2b2   : > { %5836 = vmatprep.mubr.msk.f32.mxu1 %vm839_vm1, %v7351_v62 }
 0x2b5   : > { %5837 = vmatmul.mubr.msk.f32.vlgmr.msra.gmra.mrb[0].mxu1 %vm839_vm1, %v7359_v56 }
 0x2b6   : > { %5839 = vmatprep.mubr.msk.f32.mxu1 %vm839_vm1, %v7367_v57 }
 0x2b9   : > { %5840 = vmatmul.mubr.msk.f32.gmra.mrb[2].mxu1 %vm839_vm1, %v7375_v60 }
 0x2ba   : > { %5842 = vmatprep.mubr.msk.f32.mxu1 %vm839_vm1, %v7383_v2 }
 0x2bd   : > { %5843 = vmatmul.mubr.msk.f32.gmra.mrb[4].mxu1 %vm839_vm1, %v7391_v4 }
 0x2be   : > { %5845 = vmatprep.mubr.msk.f32.mxu1 %vm839_vm1, %v7399_v6 }
 0x2c1   : > { %5846 = vmatmul.mubr.msk.f32.gmra.mrb[6].mxu1 %vm839_vm1, %v7407_v10 }
 0x2c2   : > { %5848 = vmatprep.mubr.msk.f32.mxu1 %vm839_vm1, %v7415_v15 }
 0x2c5   : > { %5849 = vmatmul.mubr.msk.f32.gmra.mrb[8].mxu1 %vm839_vm1, %v7423_v17 }
 0x2c6   : > { %5851 = vmatprep.mubr.msk.f32.mxu1 %vm839_vm1, %v7431_v21 }
 0x2c9   : > { %5852 = vmatmul.mubr.msk.f32.gmra.mrb[10].mxu1 %vm839_vm1, %v7439_v26 }
 0x2ca   : > { %5854 = vmatprep.mubr.msk.f32.mxu1 %vm839_vm1, %v7447_v40 }
 0x2cd   : > { %5855 = vmatmul.mubr.msk.f32.gmra.mrb[12].mxu1 %vm839_vm1, %v7455_v37 }
 0x2ce   : > { %5857 = vmatprep.mubr.msk.f32.mxu1 %vm839_vm1, %v7463_v38 }
 0x2d1   : > { %5858 = vmatmul.mubr.msk.f32.gmra.mrb[14].mxu1 %vm839_vm1, %v7471_v31 }
 0x2d2   : > { %5860 = vmatprep.mubr.msk.f32.mxu1 %vm839_vm1, %v7479_v30 }
 0x2d5   : > { %5861 = vmatmul.mubr.msk.f32.gmra.mrb[16].mxu1 %vm839_vm1, %v7487_v25 }
 0x2d6   : > { %5863 = vmatprep.mubr.msk.f32.mxu1 %vm839_vm1, %v7495_v9 }
 0x2d9   : > { %5864 = vmatmul.mubr.msk.f32.gmra.mrb[18].mxu1 %vm839_vm1, %v7503_v59 }
 0x2da   : > { %5866 = vmatprep.mubr.msk.f32.mxu1 %vm839_vm1, %v7511_v47  ;;  %v8334_v47 = vld [vmem:[#allocation54_spill] sm:$0xff] }
 0x2dd   : > { %5867 = vmatmul.mubr.msk.f32.gmra.mrb[20].mxu1 %vm839_vm1, %v7519_v33  ;;  %v4015_v33 = vld [vmem:[#allocation2 + $0x19a] sm:$0xff] }
 0x2de   : > { %5869 = vmatprep.mubr.msk.f32.mxu1 %vm839_vm1, %v7527_v20  ;;  %v8335_v20 = vld [vmem:[#allocation55_spill] sm:$0xff] }
 0x2e1   : > { %5870 = vmatmul.mubr.msk.f32.gmra.mrb[22].mxu1 %vm839_vm1, %v7535_v8  ;;  %v4016_v8 = vld [vmem:[#allocation2 + $0x1a2] sm:$0xff] }
 0x2e2   : > { %5872 = vmatprep.mubr.msk.f32.mxu1 %vm839_vm1, %v7543_v61 }
 0x2e5   : > { %5873 = vmatmul.mubr.msk.f32.gmra.mrb[24].mxu1 %vm839_vm1, %v7551_v51 }
 0x2e6   : > { %5875 = vmatprep.mubr.msk.f32.mxu1 %vm839_vm1, %v7559_v39 }
 0x2e9   : > { %5876 = vmatmul.mubr.msk.f32.gmra.mrb[26].mxu1 %vm839_vm1, %v8333_v29 }
 0x2ea   : > { %5878 = vmatprep.mubr.msk.f32.mxu1 %vm839_vm1, %v8334_v47  ;;  %v6256_v47 = vld [vmem:[%s6885_s15 + $0x18] sm:$0xff] }
 0x2ed   : > { %5879 = vmatmul.mubr.msk.f32.gmra.mrb[28].mxu1 %vm839_vm1, %v8335_v20 }
 0x2ee   : > { %5881 = vmatprep.mubr.msk.f32.mxu1 %vm839_vm1, %v4015_v33 }
 0x2f1   : > { %5882 = vmatmul.mubr.msk.f32.gmra.mrb[30].mxu1 %vm839_vm1, %v4016_v8  ;;  %v6257_v8 = vld [vmem:[%s6885_s15 + $0x10] sm:$0xff] }
 0x344   : > { %v5588_v61 = vpop.f32.mrb[32].mxu0 }
 0x345   : > { %v2233_v51 = vpop.f32.mrb[33].mxu0 }
 0x348   : > { %v5591_v59 = vpop.f32.mrb[34].mxu0 }
 0x349   : > { %v2243_v9 = vpop.f32.mrb[35].mxu0 }
 0x34c   : > { %v5594_v39 = vpop.f32.mrb[36].mxu0 }
 0x34d   : > { %v2253_v25 = vpop.f32.mrb[37].mxu0 }
 0x350   : > { %v7907_v30 = vpop.f32.mrb[38].mxu0 }
 0x351   : > { %v7909_v31 = vpop.f32.mrb[39].mxu0 }
 0x354   : > { %v7911_v38 = vpop.f32.mrb[40].mxu0 }
 0x355   : > { %v7913_v62 = vpop.f32.mrb[41].mxu0 }
 0x358   : > { %v7915_v56 = vpop.f32.mrb[42].mxu0 }
 0x359   : > { %v7917_v57 = vpop.f32.mrb[43].mxu0 }
 0x35c   : > { %v7919_v60 = vpop.f32.mrb[44].mxu0 }
 0x35d   : > { %v7921_v2 = vpop.f32.mrb[45].mxu0 }
 0x360   : > { %v7923_v4 = vpop.f32.mrb[46].mxu0 }
 0x361   : > { %v7925_v6 = vpop.f32.mrb[47].mxu0 }
 0x364   : > { %v7927_v10 = vpop.f32.mrb[48].mxu0 }
 0x365   : > { %v7929_v15 = vpop.f32.mrb[49].mxu0 }
 0x368   : > { %v7931_v17 = vpop.f32.mrb[50].mxu0 }
 0x369   : > { %v7933_v21 = vpop.f32.mrb[51].mxu0 }
 0x36c   : > { %v7935_v26 = vpop.f32.mrb[52].mxu0 }
 0x36d   : > { %v7937_v40 = vpop.f32.mrb[53].mxu0 }
 0x370   : > { %v7939_v34 = vpop.f32.mrb[54].mxu0 }
 0x371   : > { %v7941_v37 = vpop.f32.mrb[55].mxu0 }
 0x374   : > { %v7943_v32 = vpop.f32.mrb[56].mxu0 }
 0x375   : > { %v7945_v46 = vpop.f32.mrb[57].mxu0 }
 0x378   : > { %v7947_v48 = vpop.f32.mrb[58].mxu0 }
 0x379   : > { %v7949_v49 = vpop.f32.mrb[59].mxu0 }
 0x37c   : > { %v7951_v52 = vpop.f32.mrb[60].mxu0 }
 0x37d   : > { %v7953_v45 = vpop.f32.mrb[61].mxu0 }
 0x380   : > { %v7955_v53 = vpop.f32.mrb[62].mxu0 }
 0x381   : > { %v7957_v43 = vpop.f32.mrb[63].mxu0 }
 0x388   : > { %v5838_v19 = vpop.f32.mrb[0].mxu1 }
 0x389   : > { %v5884_v55 = vadd.f32 %v5838_v19, %v5588_v61  ;;  %v4184_v12 = vpop.f32.mrb[1].mxu1 }
 0x38a   : > { %v5885_v63 = vadd.f32 %v4184_v12, %v2233_v51 }
 0x38b   : > { %v4383_v3 = vmul.f32 %v5884_v55, %v7959_v22 }
 0x38c   : > { %v4382_v5 = vmul.f32 %v5885_v63, %v7959_v22  ;;  %v5841_v7 = vpop.f32.mrb[2].mxu1 }
 0x38d   : > { %v4422_v13 = vadd.f32 %v7961_v58, %v4383_v3  ;;  %v5886_v16 = vadd.f32 %v5841_v7, %v5591_v59  ;;  %v4194_v18 = vpop.f32.mrb[3].mxu1  ;;  %v6258_v3 = vld [vmem:[%s6885_s15 + $0x28] sm:$0xff] }
 0x38e   : > { %v4421_v23 = vadd.f32 %v7961_v58, %v4382_v5  ;;  %v5887_v41 = vadd.f32 %v4194_v18, %v2243_v9 }
 0x38f   : > { %v4454_v42 = vadd.f32 %v6254_v35, %v4422_v13  ;;  %v4385_v27 = vmul.f32 %v5886_v16, %v7959_v22  ;;  %v6259_v13 = vld [vmem:[%s6885_s15 + $0x20] sm:$0xff] }
 0x390   : > { %v4453_v0 = vadd.f32 %v6255_v14, %v4421_v23  ;;  %v4384_v50 = vmul.f32 %v5887_v41, %v7959_v22  ;;  %v5844_v36 = vpop.f32.mrb[4].mxu1 }
 0x391   : > { %v4486_v24 = vmax.f32 %v4454_v42, 0.0  ;;  %v4424_v11 = vadd.f32 %v7961_v58, %v4385_v27  ;;  %v5888_v1 = vadd.f32 %v5844_v36, %v5594_v39  ;;  %v4204_v54 = vpop.f32.mrb[5].mxu1 }
 0x392   : > { %v4485_v44 = vmax.f32 %v4453_v0, 0.0  ;;  %v4423_v28 = vadd.f32 %v7961_v58, %v4384_v50  ;;  %v5889_v29 = vadd.f32 %v4204_v54, %v2253_v25  ;;  %v6260_v0 = vld [vmem:[%s6885_s15 + $0x38] sm:$0xff] }
 0x393   : > { %4518 = vst.msk [vmem:[%s7975_s8 + $0x8] sm:$0xff] %vm407_vm0, %v4486_v24  ;;  %v4456_v33 = vadd.f32 %v6256_v47, %v4424_v11  ;;  %v4387_v20 = vmul.f32 %v5888_v1, %v7959_v22  ;;  %v6261_v24 = vld [vmem:[%s6885_s15 + $0x30] sm:$0xff] }
 0x394   : > { %4517 = vst.msk [vmem:[%s7975_s8] sm:$0xff] %vm407_vm0, %v4485_v44  ;;  %v4455_v61 = vadd.f32 %v6257_v8, %v4423_v28  ;;  %v4386_v51 = vmul.f32 %v5889_v29, %v7959_v22  ;;  %v5847_v59 = vpop.f32.mrb[6].mxu1 }
 0x395   : > { %v4488_v9 = vmax.f32 %v4456_v33, 0.0  ;;  %v4426_v39 = vadd.f32 %v7961_v58, %v4387_v20  ;;  %v5890_v25 = vadd.f32 %v5847_v59, %v7907_v30  ;;  %v4214_v19 = vpop.f32.mrb[7].mxu1  ;;  %v6262_v20 = vld [vmem:[%s6885_s15 + $0x48] sm:$0xff] }
 0x396   : > { %v4487_v55 = vmax.f32 %v4455_v61, 0.0  ;;  %v4425_v12 = vadd.f32 %v7961_v58, %v4386_v51  ;;  %v5891_v63 = vadd.f32 %v4214_v19, %v7909_v31  ;;  %v6263_v51 = vld [vmem:[%s6885_s15 + $0x40] sm:$0xff] }
 0x397   : > { %4520 = vst.msk [vmem:[%s7975_s8 + $0x18] sm:$0xff] %vm407_vm0, %v4488_v9  ;;  %v4458_v5 = vadd.f32 %v6258_v3, %v4426_v39  ;;  %v4389_v7 = vmul.f32 %v5890_v25, %v7959_v22  ;;  %v6264_v3 = vld [vmem:[%s6885_s15 + $0x58] sm:$0xff] }
 0x398   : > { %4519 = vst.msk [vmem:[%s7975_s8 + $0x10] sm:$0xff] %vm407_vm0, %v4487_v55  ;;  %v4457_v30 = vadd.f32 %v6259_v13, %v4425_v12  ;;  %v4388_v16 = vmul.f32 %v5891_v63, %v7959_v22  ;;  %v5850_v18 = vpop.f32.mrb[8].mxu1  ;;  %v6265_v13 = vld [vmem:[%s6885_s15 + $0x50] sm:$0xff] }
 0x399   : > { %v4490_v23 = vmax.f32 %v4458_v5, 0.0  ;;  %v4428_v31 = vadd.f32 %v7961_v58, %v4389_v7  ;;  %v5892_v41 = vadd.f32 %v5850_v18, %v7911_v38  ;;  %v4224_v35 = vpop.f32.mrb[9].mxu1 }
 0x39a   : > { %v4489_v42 = vmax.f32 %v4457_v30, 0.0  ;;  %v4427_v27 = vadd.f32 %v7961_v58, %v4388_v16  ;;  %v5893_v14 = vadd.f32 %v4224_v35, %v7913_v62 }
 0x39b   : > { %4522 = vst.msk [vmem:[%s7975_s8 + $0x28] sm:$0xff] %vm407_vm0, %v4490_v23  ;;  %v4460_v50 = vadd.f32 %v6260_v0, %v4428_v31  ;;  %v4391_v36 = vmul.f32 %v5892_v41, %v7959_v22 }
 0x39c   : > { %4521 = vst.msk [vmem:[%s7975_s8 + $0x20] sm:$0xff] %vm407_vm0, %v4489_v42  ;;  %v4459_v38 = vadd.f32 %v6261_v24, %v4427_v27  ;;  %v4390_v11 = vmul.f32 %v5893_v14, %v7959_v22  ;;  %v5853_v1 = vpop.f32.mrb[10].mxu1  ;;  %v6266_v27 = vld [vmem:[%s6885_s15 + $0x68] sm:$0xff] }
 0x39d   : > { %v4492_v54 = vmax.f32 %v4460_v50, 0.0  ;;  %v4430_v62 = vadd.f32 %v7961_v58, %v4391_v36  ;;  %v5894_v44 = vadd.f32 %v5853_v1, %v7915_v56  ;;  %v4234_v28 = vpop.f32.mrb[11].mxu1  ;;  %v6267_v50 = vld [vmem:[%s6885_s15 + $0x60] sm:$0xff] }
 0x39e   : > { %v4491_v29 = vmax.f32 %v4459_v38, 0.0  ;;  %v4429_v47 = vadd.f32 %v7961_v58, %v4390_v11  ;;  %v5895_v33 = vadd.f32 %v4234_v28, %v7917_v57  ;;  %v6268_v28 = vld [vmem:[%s6885_s15 + $0x78] sm:$0xff] }
 0x39f   : > { %4524 = vst.msk [vmem:[%s7975_s8 + $0x38] sm:$0xff] %vm407_vm0, %v4492_v54  ;;  %v4462_v8 = vadd.f32 %v6262_v20, %v4430_v62  ;;  %v4393_v61 = vmul.f32 %v5894_v44, %v7959_v22 }
 0x3a0   : > { %4523 = vst.msk [vmem:[%s7975_s8 + $0x30] sm:$0xff] %vm407_vm0, %v4491_v29  ;;  %v4461_v56 = vadd.f32 %v6263_v51, %v4429_v47  ;;  %v4392_v59 = vmul.f32 %v5895_v33, %v7959_v22  ;;  %v5856_v9 = vpop.f32.mrb[12].mxu1  ;;  %v6269_v33 = vld [vmem:[%s6885_s15 + $0x70] sm:$0xff] }
 0x3a1   : > { %v4494_v39 = vmax.f32 %v4462_v8, 0.0  ;;  %v4432_v57 = vadd.f32 %v7961_v58, %v4393_v61  ;;  %v5896_v25 = vadd.f32 %v5856_v9, %v7919_v60  ;;  %v4244_v19 = vpop.f32.mrb[13].mxu1 }
 0x3a2   : > { %v4493_v55 = vmax.f32 %v4461_v56, 0.0  ;;  %v4431_v12 = vadd.f32 %v7961_v58, %v4392_v59  ;;  %v5897_v63 = vadd.f32 %v4244_v19, %v7921_v2 }
 0x3a3   : > { %4526 = vst.msk [vmem:[%s7975_s8 + $0x48] sm:$0xff] %vm407_vm0, %v4494_v39  ;;  %v4464_v5 = vadd.f32 %v6264_v3, %v4432_v57  ;;  %v4395_v7 = vmul.f32 %v5896_v25, %v7959_v22  ;;  %v6270_v57 = vld [vmem:[%s6885_s15 + $0x88] sm:$0xff] }
 0x3a4   : > { %4525 = vst.msk [vmem:[%s7975_s8 + $0x40] sm:$0xff] %vm407_vm0, %v4493_v55  ;;  %v4463_v60 = vadd.f32 %v6265_v13, %v4431_v12  ;;  %v4394_v30 = vmul.f32 %v5897_v63, %v7959_v22  ;;  %v5859_v16 = vpop.f32.mrb[14].mxu1  ;;  %v6271_v55 = vld [vmem:[%s6885_s15 + $0x80] sm:$0xff] }
 0x3a5   : > { %v4496_v18 = vmax.f32 %v4464_v5, 0.0  ;;  %v4434_v2 = vadd.f32 %v7961_v58, %v4395_v7  ;;  %v5898_v23 = vadd.f32 %v5859_v16, %v7923_v4  ;;  %v4254_v31 = vpop.f32.mrb[15].mxu1  ;;  %v6272_v16 = vld [vmem:[%s6885_s15 + $0x98] sm:$0xff] }
 0x3a6   : > { %v4495_v41 = vmax.f32 %v4463_v60, 0.0  ;;  %v4433_v35 = vadd.f32 %v7961_v58, %v4394_v30  ;;  %v5899_v42 = vadd.f32 %v4254_v31, %v7925_v6 }
 0x3a7   : > { %4528 = vst.msk [vmem:[%s7975_s8 + $0x58] sm:$0xff] %vm407_vm0, %v4496_v18  ;;  %v4466_v14 = vadd.f32 %v6266_v27, %v4434_v2  ;;  %v4397_v0 = vmul.f32 %v5898_v23, %v7959_v22  ;;  %v6273_v23 = vld [vmem:[%s6885_s15 + $0x90] sm:$0xff] }
 0x3a8   : > { %4527 = vst.msk [vmem:[%s7975_s8 + $0x50] sm:$0xff] %vm407_vm0, %v4495_v41  ;;  %v4465_v4 = vadd.f32 %v6267_v50, %v4433_v35  ;;  %v4396_v36 = vmul.f32 %v5899_v42, %v7959_v22  ;;  %v5862_v24 = vpop.f32.mrb[16].mxu1 }
 0x3a9   : > { %v4498_v38 = vmax.f32 %v4466_v14, 0.0  ;;  %v4436_v6 = vadd.f32 %v7961_v58, %v4397_v0  ;;  %v5900_v11 = vadd.f32 %v5862_v24, %v7927_v10  ;;  %v4264_v1 = vpop.f32.mrb[17].mxu1 }
 0x3aa   : > { %v4497_v54 = vmax.f32 %v4465_v4, 0.0  ;;  %v4435_v62 = vadd.f32 %v7961_v58, %v4396_v36  ;;  %v5901_v44 = vadd.f32 %v4264_v1, %v7929_v15  ;;  %v6274_v4 = vld [vmem:[%s6885_s15 + $0xa8] sm:$0xff] }
 0x3ab   : > { %4530 = vst.msk [vmem:[%s7975_s8 + $0x68] sm:$0xff] %vm407_vm0, %v4498_v38  ;;  %v4468_v29 = vadd.f32 %v6268_v28, %v4436_v6  ;;  %v4399_v47 = vmul.f32 %v5900_v11, %v7959_v22  ;;  %v6275_v38 = vld [vmem:[%s6885_s15 + $0xa0] sm:$0xff] }
 0x3ac   : > { %4529 = vst.msk [vmem:[%s7975_s8 + $0x60] sm:$0xff] %vm407_vm0, %v4497_v54  ;;  %v4467_v10 = vadd.f32 %v6269_v33, %v4435_v62  ;;  %v4398_v20 = vmul.f32 %v5901_v44, %v7959_v22  ;;  %v5865_v8 = vpop.f32.mrb[18].mxu1 }
 0x3ad   : > { %v4500_v61 = vmax.f32 %v4468_v29, 0.0  ;;  %v4438_v15 = vadd.f32 %v7961_v58, %v4399_v47  ;;  %v5902_v51 = vadd.f32 %v5865_v8, %v7931_v17  ;;  %v4274_v56 = vpop.f32.mrb[19].mxu1  ;;  %v6276_v47 = vld [vmem:[%s6885_s15 + $0xb8] sm:$0xff] }
 0x3ae   : > { %v4499_v59 = vmax.f32 %v4467_v10, 0.0  ;;  %v4437_v9 = vadd.f32 %v7961_v58, %v4398_v20  ;;  %v5903_v39 = vadd.f32 %v4274_v56, %v7933_v21  ;;  %v6277_v20 = vld [vmem:[%s6885_s15 + $0xb0] sm:$0xff] }
 0x3af   : > { %4532 = vst.msk [vmem:[%s7975_s8 + $0x78] sm:$0xff] %vm407_vm0, %v4500_v61  ;;  %v4470_v25 = vadd.f32 %v6270_v57, %v4438_v15  ;;  %v4401_v19 = vmul.f32 %v5902_v51, %v7959_v22  ;;  %v6278_v57 = vld [vmem:[%s6885_s15 + $0xc8] sm:$0xff] }
 0x3b0   : > { %4531 = vst.msk [vmem:[%s7975_s8 + $0x70] sm:$0xff] %vm407_vm0, %v4499_v59  ;;  %v4469_v17 = vadd.f32 %v6271_v55, %v4437_v9  ;;  %v4400_v12 = vmul.f32 %v5903_v39, %v7959_v22  ;;  %v5868_v63 = vpop.f32.mrb[20].mxu1  ;;  %v6279_v55 = vld [vmem:[%s6885_s15 + $0xc0] sm:$0xff] }
 0x3b1   : > { %v4502_v3 = vmax.f32 %v4470_v25, 0.0  ;;  %v4440_v21 = vadd.f32 %v7961_v58, %v4401_v19  ;;  %v5904_v5 = vadd.f32 %v5868_v63, %v7935_v26  ;;  %v4284_v7 = vpop.f32.mrb[21].mxu1 }
 0x3b2   : > { %v4501_v13 = vmax.f32 %v4469_v17, 0.0  ;;  %v4439_v60 = vadd.f32 %v7961_v58, %v4400_v12  ;;  %v5905_v30 = vadd.f32 %v4284_v7, %v7937_v40 }
 0x3b3   : > { %4534 = vst.msk [vmem:[%s7975_s8 + $0x88] sm:$0xff] %vm407_vm0, %v4502_v3  ;;  %v4472_v18 = vadd.f32 %v6272_v16, %v4440_v21  ;;  %v4403_v2 = vmul.f32 %v5904_v5, %v7959_v22 }
 0x3b4   : > { %4533 = vst.msk [vmem:[%s7975_s8 + $0x80] sm:$0xff] %vm407_vm0, %v4501_v13  ;;  %v4471_v26 = vadd.f32 %v6273_v23, %v4439_v60  ;;  %v4402_v31 = vmul.f32 %v5905_v30, %v7959_v22  ;;  %v5871_v41 = vpop.f32.mrb[22].mxu1  ;;  %v6280_v60 = vld [vmem:[%s6885_s15 + $0xd8] sm:$0xff] }
 0x3b5   : > { %v4504_v35 = vmax.f32 %v4472_v18, 0.0  ;;  %v4442_v40 = vadd.f32 %v7961_v58, %v4403_v2  ;;  %v5906_v42 = vadd.f32 %v5871_v41, %v7939_v34  ;;  %v4294_v27 = vpop.f32.mrb[23].mxu1  ;;  %v6281_v18 = vld [vmem:[%s6885_s15 + $0xd0] sm:$0xff] }
 0x3b6   : > { %v4503_v14 = vmax.f32 %v4471_v26, 0.0  ;;  %v4441_v0 = vadd.f32 %v7961_v58, %v4402_v31  ;;  %v5907_v50 = vadd.f32 %v4294_v27, %v7941_v37  ;;  %v6282_v27 = vld [vmem:[%s6885_s15 + $0xe8] sm:$0xff] }
 0x3b7   : > { %4536 = vst.msk [vmem:[%s7975_s8 + $0x98] sm:$0xff] %vm407_vm0, %v4504_v35  ;;  %v4474_v36 = vadd.f32 %v6274_v4, %v4442_v40  ;;  %v4405_v24 = vmul.f32 %v5906_v42, %v7959_v22 }
 0x3b8   : > { %4535 = vst.msk [vmem:[%s7975_s8 + $0x90] sm:$0xff] %vm407_vm0, %v4503_v14  ;;  %v4473_v34 = vadd.f32 %v6275_v38, %v4441_v0  ;;  %v4404_v6 = vmul.f32 %v5907_v50, %v7959_v22  ;;  %v5874_v11 = vpop.f32.mrb[24].mxu1 }
 0x3b9   : > { %v4506_v1 = vmax.f32 %v4474_v36, 0.0  ;;  %v4444_v37 = vadd.f32 %v7961_v58, %v4405_v24  ;;  %v5908_v54 = vadd.f32 %v5874_v11, %v7943_v32  ;;  %v4304_v62 = vpop.f32.mrb[25].mxu1  ;;  %v6285_v11 = vld [vmem:[%s6885_s15 + $0xf0] sm:$0xff] }
 0x3ba   : > { %v4505_v44 = vmax.f32 %v4473_v34, 0.0  ;;  %v4443_v28 = vadd.f32 %v7961_v58, %v4404_v6  ;;  %v5909_v29 = vadd.f32 %v4304_v62, %v7945_v46  ;;  %v6284_v34 = vld [vmem:[%s6885_s15 + $0xf8] sm:$0xff] }
 0x3bb   : > { %4538 = vst.msk [vmem:[%s7975_s8 + $0xa8] sm:$0xff] %vm407_vm0, %v4506_v1  ;;  %v4476_v33 = vadd.f32 %v6276_v47, %v4444_v37  ;;  %v4407_v10 = vmul.f32 %v5908_v54, %v7959_v22 }
 0x3bc   : > { %4537 = vst.msk [vmem:[%s7975_s8 + $0xa0] sm:$0xff] %vm407_vm0, %v4505_v44  ;;  %v4475_v32 = vadd.f32 %v6277_v20, %v4443_v28  ;;  %v4406_v8 = vmul.f32 %v5909_v29, %v7959_v22  ;;  %v5877_v61 = vpop.f32.mrb[26].mxu1 }
 0x3bd   : > { %v4508_v15 = vmax.f32 %v4476_v33, 0.0  ;;  %v4446_v46 = vadd.f32 %v7961_v58, %v4407_v10  ;;  %v5910_v51 = vadd.f32 %v5877_v61, %v7947_v48  ;;  %v4314_v56 = vpop.f32.mrb[27].mxu1 }
 0x3be   : > { %v4507_v59 = vmax.f32 %v4475_v32, 0.0  ;;  %v4445_v9 = vadd.f32 %v7961_v58, %v4406_v8  ;;  %v5911_v39 = vadd.f32 %v4314_v56, %v7949_v49 }
 0x3bf   : > { %4540 = vst.msk [vmem:[%s7975_s8 + $0xb8] sm:$0xff] %vm407_vm0, %v4508_v15  ;;  %v4478_v25 = vadd.f32 %v6278_v57, %v4446_v46  ;;  %v4409_v19 = vmul.f32 %v5910_v51, %v7959_v22 }
 0x3c0   : > { %4539 = vst.msk [vmem:[%s7975_s8 + $0xb0] sm:$0xff] %vm407_vm0, %v4507_v59  ;;  %v4477_v48 = vadd.f32 %v6279_v55, %v4445_v9  ;;  %v4408_v17 = vmul.f32 %v5911_v39, %v7959_v22  ;;  %v5880_v12 = vpop.f32.mrb[28].mxu1 }
 0x3c1   : > { %v4510_v63 = vmax.f32 %v4478_v25, 0.0  ;;  %v4448_v49 = vadd.f32 %v7961_v58, %v4409_v19  ;;  %v5912_v3 = vadd.f32 %v5880_v12, %v7951_v52  ;;  %v4324_v21 = vpop.f32.mrb[29].mxu1 }
 0x3c2   : > { %v4509_v5 = vmax.f32 %v4477_v48, 0.0  ;;  %v4447_v7 = vadd.f32 %v7961_v58, %v4408_v17  ;;  %v5913_v13 = vadd.f32 %v4324_v21, %v7953_v45 }
 0x3c3   : > { %4542 = vst.msk [vmem:[%s7975_s8 + $0xc8] sm:$0xff] %vm407_vm0, %v4510_v63  ;;  %v4480_v30 = vadd.f32 %v6280_v60, %v4448_v49  ;;  %v4411_v16 = vmul.f32 %v5912_v3, %v7959_v22 }
 0x3c4   : > { %4541 = vst.msk [vmem:[%s7975_s8 + $0xc0] sm:$0xff] %vm407_vm0, %v4509_v5  ;;  %v4479_v52 = vadd.f32 %v6281_v18, %v4447_v7  ;;  %v4410_v2 = vmul.f32 %v5913_v13, %v7959_v22  ;;  %v5883_v23 = vpop.f32.mrb[30].mxu1 }
 0x3c5   : > { %v4512_v26 = vmax.f32 %v4480_v30, 0.0  ;;  %v4450_v45 = vadd.f32 %v7961_v58, %v4411_v16  ;;  %v5914_v31 = vadd.f32 %v5883_v23, %v7955_v53  ;;  %v4334_v41 = vpop.f32.mrb[31].mxu1  ;;  %v6283_v53 = vld [vmem:[%s6885_s15 + $0xe0] sm:$0xff] }
 0x3c6   : > { %v4511_v35 = vmax.f32 %v4479_v52, 0.0  ;;  %v4449_v40 = vadd.f32 %v7961_v58, %v4410_v2  ;;  %v5915_v42 = vadd.f32 %v4334_v41, %v7957_v43 }
 0x3c7   : > { %4544 = vst.msk [vmem:[%s7975_s8 + $0xd8] sm:$0xff] %vm407_vm0, %v4512_v26  ;;  %v4482_v14 = vadd.f32 %v6282_v27, %v4450_v45  ;;  %v4413_v0 = vmul.f32 %v5914_v31, %v7959_v22 }
 0x3c8   : > { %4543 = vst.msk [vmem:[%s7975_s8 + $0xd0] sm:$0xff] %vm407_vm0, %v4511_v35  ;;  %v4481_v50 = vadd.f32 %v6283_v53, %v4449_v40  ;;  %v4412_v4 = vmul.f32 %v5915_v42, %v7959_v22 }
 0x3c9   : > { %v4514_v36 = vmax.f32 %v4482_v14, 0.0  ;;  %v4452_v24 = vadd.f32 %v7961_v58, %v4413_v0 }
 0x3ca   : > { %v4513_v43 = vmax.f32 %v4481_v50, 0.0  ;;  %v4451_v38 = vadd.f32 %v7961_v58, %v4412_v4 }
 0x3cb   : > { %4546 = vst.msk [vmem:[%s7975_s8 + $0xe8] sm:$0xff] %vm407_vm0, %v4514_v36  ;;  %v4484_v6 = vadd.f32 %v6284_v34, %v4452_v24 }
 0x3cc   : > { %4545 = vst.msk [vmem:[%s7975_s8 + $0xe0] sm:$0xff] %vm407_vm0, %v4513_v43  ;;  %v4483_v22 = vadd.f32 %v6285_v11, %v4451_v38 }
 0x3cd   : > { %v4516_v1 = vmax.f32 %v4484_v6, 0.0 }
 0x3ce   : > { %v4515_v58 = vmax.f32 %v4483_v22, 0.0 }
 0x3cf   : > { %4548 = vst.msk [vmem:[%s7975_s8 + $0xf8] sm:$0xff] %vm407_vm0, %v4516_v1 }
 0x3d0   : > { %4547 = vst.msk [vmem:[%s7975_s8 + $0xf0] sm:$0xff] %vm407_vm0, %v4515_v58 }
 0x3d1   : > { %6497 = shalt.err (!%p6494_p8)
}
 0x3d2   : > { %s6498_s9 = scalar_lea.hbm %s8154_s12, 4096  ;;  %s6502_s8 = scalar_lea.hbm %s8211_s7, 8192 }
 0x3d3   : > { %p6499_p10 = scmp.ne.s32.totalorder %s8154_s12, %s6498_s9  ;;  %p6503_p0 = scmp.lt.u32.totalorder %s8154_s12, %s8211_s7 }
 0x3d4   : > { %p6504_p5 = scmp.lt.u32.totalorder %s6502_s8, %s6498_s9  ;;  %p6506_p6 = scmp.lt.u32.totalorder %s6498_s9, %s8154_s12 }
 0x3d5   : > { %p6500_p4 = pnand %p6499_p10, %p8336_p9 }
 0x3d6   : > { %p6505_p7 = por %p6504_p5, %p6503_p0 }
 0x3d7   : > { %p6501_p11 = pneg %p6500_p4 }
 0x3d8   : > { %p6507_p12 = por %p6506_p6, %p6505_p7 }
 0x3da   : > { %p6508_p13 = pnand %p6507_p12, %p6501_p11 }
 0x3dc   : > { %6511 = shalt.err (!%p6508_p13)
}
 0x3dd   : > { %s6577_s21 = smov 128   ;;  %s6578_s16 = smov 8  }
 0x3de   : > { %6166 = dma.vmem_to_hbm [thread:$0]  (%p8336_p9), %s8156_s19, 4096, %s8154_s12, %s4550_s30, %s6577_s21, %s6577_s21, %s6578_s16  }
 0x3df PF: > { %s4578_s17 = sand.u32 1, %s6550_s24   ;;  %p8337_p1 = scmp.ne.s32.totalorder %s8257_s14, 0 }
 0x3e0   : > { %p8338_p3 = scmp.ge.s32.totalorder %s6562_s27, 2  ;;  %s4579_s10 = scalar_lea.sflag [#allocation5], %s4578_s17 }
 0x3e2   : > { %p6192_p2 = pnand %p8338_p3, %p8337_p1 }
 0x3e4   : > { %6545 = dma.done.wait (!%p6192_p2), %s4579_s10, 4096  }
 0x3e5   : > { %6547 = vsyncadd (!%p6192_p2), %s4579_s10, 4294963200  ;;  %p23_p8 = scmp.ge.s32.totalorder %s6800_s13, 4   ;;  %s8339_s24 = smov %s6554_s25 }
 0x3e6   : > { %s8340_s25 = smov %s6558_s26  ;;  %s8341_s26 = smov %s6811_s22 }
 0x3e7   : > { %s8342_s27 = smov %s6800_s13  ;;  %25 = sbr.rel (!%p23_p8) target bundleno = 8 (0x8), region = 127 }
 0x3ee   :  { %4584 = vsyncpa [#allocation4], 1 }
 0x3ef   :  { %4586 = vsyncpa [#allocation4 + $0x1], 1 }
 0x3f0   :  { %4587 = vsyncpa [#allocation7], 1 }
 0x3f1   :  { %4588 = vsyncpa [#allocation10], 1 }
 0x3f2   :  { %4589 = vsyncpa [#allocation13], 1 }
 0x3f3   :  { %4590 = vsyncpa [#allocation5], 1 }
 0x3f4   :  { %4592 = vsyncpa [#allocation5 + $0x1], 1 }

</bundles_post_ra>
